<compile_context>
chip_gen: v5e
topology: v5e:2x2
jax: 0.10.0
libtpu: 0.0.40
codegen_flags: <defaults>
</compile_context>

<pallas_src>
import functools

import jax
import jax.numpy as jnp
from jax.experimental import pallas as pl
from jax.experimental.pallas import tpu as pltpu


LANE = 128

# ---- slot indices inside the packed weight slab [NUM_W, 128, 128]
W_M1, W_M2, W_M3 = 0, 1, 2                      # meta_network
W_R1, W_RE, W_R2, W_RB2 = 3, 4, 5, 6            # fused regime networks
W_P1, W_P2 = 7, 8                               # block-diag model processors
W_S1, W_S2 = 9, 10                              # stacking network
W_C1A, W_C1B, W_C1C, W_C2 = 11, 12, 13, 14      # combined network (concat-free)
W_F1, W_F2 = 15, 16                             # financial projector
NUM_W = 17

# ---- row indices inside the packed bias slab [BIAS_ROWS, 128]
B_M1, B_M2, B_M3 = 0, 1, 2
B_R1 = 3
B_P1, B_P2 = 4, 5
B_S1, B_S2 = 6, 7
B_C1, B_C2 = 8, 9
B_F1, B_F2 = 10, 11
NUM_B = 12
BIAS_ROWS = 16  # padded to a sublane multiple


# ----------------------------- Pallas kernel --------------------------------
def meta_learner_kernel(in_ref, w_ref, b_ref, weights_out, fin_out, *, num_models):
    x = in_ref[0]    # [TB, 128] meta features        (valid lanes 0:F,   rest 0)
    mo = in_ref[1]   # [TB, 128] flattened model outs (valid lanes 0:M*T, rest 0)
    mr = in_ref[2]   # [TB, 128] market regime probs  (valid lanes 0:R,   rest 0)

    def mm(a, i):
        return jnp.dot(a, w_ref[i], preferred_element_type=jnp.float32)

    def bias(i):
        return b_ref[i:i + 1, :]

    relu = lambda z: jnp.maximum(z, 0.0)

    # ---- meta_network: Linear->ReLU->(Dropout=id)->Linear->ReLU->(Dropout=id)->Linear
    h = relu(mm(x, W_M1) + bias(B_M1))
    h = relu(mm(h, W_M2) + bias(B_M2))
    meta_w = mm(h, W_M3) + bias(B_M3)                       # valid lanes 0:M

    # ---- regime networks fused: one [F, R*H] matmul, per-regime scaling of the
    #      hidden block by mr (via expansion matmul), one [R*H, M] matmul.
    hr = relu(mm(x, W_R1) + bias(B_R1))                     # [TB, R*H]
    mr_exp = mm(mr, W_RE)                                   # [TB, R*H] (prob per H-block)
    regime_w = mm(hr * mr_exp, W_R2) + mm(mr, W_RB2)        # valid lanes 0:M

    # ---- per-model processors (block-diagonal fused) + stacking network
    hp = relu(mm(mo, W_P1) + bias(B_P1))                    # [TB, M*H]
    processed = mm(hp, W_P2) + bias(B_P2)                   # valid lanes 0:H (== concat)
    hs = relu(mm(processed, W_S1) + bias(B_S1))
    stacked_w = mm(hs, W_S2) + bias(B_S2)                   # valid lanes 0:M

    # ---- combined network without lane concatenation
    hc = relu(mm(meta_w, W_C1A) + mm(regime_w, W_C1B)
              + mm(stacked_w, W_C1C) + bias(B_C1))
    final = mm(hc, W_C2) + bias(B_C2)                       # valid lanes 0:M

    # ---- masked softmax over the first num_models lanes
    lane = jax.lax.broadcasted_iota(jnp.int32, final.shape, 1)
    logits = jnp.where(lane < num_models, final, -1e30)
    m = jnp.max(logits, axis=1, keepdims=True)
    e = jnp.exp(logits - m)
    sm = e / jnp.sum(e, axis=1, keepdims=True)              # padded lanes exactly 0
    weights_out[...] = sm.astype(weights_out.dtype)

    # ---- financial projector
    hf = relu(mm(sm, W_F1) + bias(B_F1))
    fin_out[...] = (mm(hf, W_F2) + bias(B_F2)).astype(fin_out.dtype)


# ----------------------------- Host-side packing -----------------------------
def _pad2(a, rows=LANE, cols=LANE):
    a = jnp.asarray(a, jnp.float32)
    r, c = a.shape
    assert r <= rows and c <= cols, (a.shape, rows, cols)
    return jnp.pad(a, ((0, rows - r), (0, cols - c)))


def _block_diag(blocks):
    rows = sum(b.shape[0] for b in blocks)
    cols = sum(b.shape[1] for b in blocks)
    out = jnp.zeros((rows, cols), jnp.float32)
    r = c = 0
    for b in blocks:
        out = out.at[r:r + b.shape[0], c:c + b.shape[1]].set(b.astype(jnp.float32))
        r += b.shape[0]
        c += b.shape[1]
    return out


def pack_params(p):
    (mW1, mb1, mW2, mb2, mW3, mb3,
     rW1, rb1, rW2, rb2,
     pW1, pb1, pW2, pb2,
     sW1, sb1, sW2, sb2,
     cW1, cb1, cW2, cb2,
     fW1, fb1, fW2, fb2) = p

    F, H = mW1.shape
    M = mW3.shape[1]
    R = rW1.shape[0]
    T = pW1.shape[1]
    assert R * H <= LANE and M * H <= LANE and M * T <= LANE and 3 * M <= LANE

    # fused regime stack
    rW1f = jnp.concatenate([rW1[i] for i in range(R)], axis=1)    # [F, R*H]
    rb1f = jnp.concatenate([rb1[i] for i in range(R)], axis=1)    # [1, R*H]
    E_mr = _block_diag([jnp.ones((1, H), jnp.float32)] * R)       # [R, R*H]
    rW2v = jnp.concatenate([rW2[i] for i in range(R)], axis=0)    # [R*H, M]
    rb2m = jnp.concatenate([rb2[i] for i in range(R)], axis=0)    # [R, M]

    # block-diagonal model processors
    pW1bd = _block_diag([pW1[i] for i in range(M)])               # [M*T, M*H]
    pb1f = jnp.concatenate([pb1[i] for i in range(M)], axis=1)    # [1, M*H]
    pW2bd = _block_diag([pW2[i] for i in range(M)])               # [M*H, H]
    pb2f = jnp.concatenate([pb2[i] for i in range(M)], axis=1)    # [1, H]

    # combined network: split the concat input into three K=M slices
    cW1a, cW1b, cW1c = cW1[:M], cW1[M:2 * M], cW1[2 * M:3 * M]

    weights = [None] * NUM_W
    weights[W_M1], weights[W_M2], weights[W_M3] = mW1, mW2, mW3
    weights[W_R1], weights[W_RE], weights[W_R2], weights[W_RB2] = rW1f, E_mr, rW2v, rb2m
    weights[W_P1], weights[W_P2] = pW1bd, pW2bd
    weights[W_S1], weights[W_S2] = sW1, sW2
    weights[W_C1A], weights[W_C1B], weights[W_C1C], weights[W_C2] = cW1a, cW1b, cW1c, cW2
    weights[W_F1], weights[W_F2] = fW1, fW2
    w_stack = jnp.stack([_pad2(w) for w in weights])              # [NUM_W, 128, 128]

    biases = [None] * NUM_B
    biases[B_M1], biases[B_M2], biases[B_M3] = mb1, mb2, mb3
    biases[B_R1] = rb1f
    biases[B_P1], biases[B_P2] = pb1f, pb2f
    biases[B_S1], biases[B_S2] = sb1, sb2
    biases[B_C1], biases[B_C2] = cb1, cb2
    biases[B_F1], biases[B_F2] = fb1, fb2
    b_stack = jnp.concatenate([_pad2(b, rows=1) for b in biases], axis=0)
    b_stack = jnp.pad(b_stack, ((0, BIAS_ROWS - NUM_B), (0, 0)))  # [16, 128]
    return w_stack, b_stack


def pack_inputs(meta, mo, mr, b_pad):
    B = meta.shape[0]
    mo_flat = mo.reshape(B, -1)

    def place(a):
        buf = jnp.zeros((b_pad, LANE), jnp.float32)
        return buf.at[:B, :a.shape[1]].set(a.astype(jnp.float32))

    return jnp.stack([place(meta), place(mo_flat), place(mr)])    # [3, b_pad, 128]


# ----------------------------- Host wrapper ----------------------------------
def meta_learner_forward(meta_features, model_outputs, market_regimes, flat_params,
                         num_models, tile_b=8):
    assert tile_b % 8 == 0
    B = meta_features.shape[0]
    b_pad = ((B + tile_b - 1) // tile_b) * tile_b

    w_stack, b_stack = pack_params(flat_params)
    in_buf = pack_inputs(meta_features, model_outputs, market_regimes, b_pad)

    kernel = functools.partial(meta_learner_kernel, num_models=num_models)
    w_out, f_out = pl.pallas_call(
        kernel,
        out_shape=(jax.ShapeDtypeStruct((b_pad, LANE), jnp.float32),
                   jax.ShapeDtypeStruct((b_pad, LANE), jnp.float32)),
        grid=(b_pad // tile_b,),
        in_specs=[
            pl.BlockSpec((3, tile_b, LANE), lambda i: (0, i, 0)),          # inputs
            pl.BlockSpec((NUM_W, LANE, LANE), lambda i: (0, 0, 0)),        # weights (resident)
            pl.BlockSpec((BIAS_ROWS, LANE), lambda i: (0, 0)),             # biases (resident)
        ],
        out_specs=(pl.BlockSpec((tile_b, LANE), lambda i: (i, 0)),
                   pl.BlockSpec((tile_b, LANE), lambda i: (i, 0))),
        compiler_params=pltpu.CompilerParams(dimension_semantics=("parallel",)),
    )(in_buf, w_stack, b_stack)

    return {"weights": w_out[:B, :num_models],
            "financial_metrics": f_out[:B, :4]}


# ----------------------------- Param init -----------------------------------
def init_params(key, F, H, M, T, R=4):
    ks = iter(jax.random.split(key, 64))

    def w(shape):
        return (0.1 * jax.random.normal(next(ks), shape)).astype(jnp.float32)

    return [
        # meta_network
        w((F, H)), w((1, H)), w((H, H)), w((1, H)), w((H, M)), w((1, M)),
        # regime_networks (stacked over R)
        w((R, F, H)), w((R, 1, H)), w((R, H, M)), w((R, 1, M)),
        # model_processors (stacked over M)
        w((M, T, H)), w((M, 1, H)), w((M, H, H // M)), w((M, 1, H // M)),
        # stacking_network
        w((H, H)), w((1, H)), w((H, M)), w((1, M)),
        # combined_network (input_dim = 3 * M: meta + regime + stacked)
        w((3 * M, H)), w((1, H)), w((H, M)), w((1, M)),
        # financial_projector
        w((M, H)), w((1, H)), w((H, 4)), w((1, 4)),
    ]


# ----------------------------- Pure-JAX reference ---------------------------
def reference_forward(meta, mo, mr, p, M, R=4):
    (mW1, mb1, mW2, mb2, mW3, mb3,
     rW1, rb1, rW2, rb2,
     pW1, pb1, pW2, pb2,
     sW1, sb1, sW2, sb2,
     cW1, cb1, cW2, cb2,
     fW1, fb1, fW2, fb2) = p

    relu = lambda z: jnp.maximum(z, 0.0)
    h = relu(meta @ mW1 + mb1)
    h = relu(h @ mW2 + mb2)
    meta_w = h @ mW3 + mb3

    regime_w = jnp.zeros_like(meta_w)
    for i in range(R):
        pred = relu(meta @ rW1[i] + rb1[i]) @ rW2[i] + rb2[i]
        regime_w = regime_w + pred * mr[:, i:i + 1]

    proc = []
    for i in range(M):
        proc.append(relu(mo[:, i, :] @ pW1[i] + pb1[i]) @ pW2[i] + pb2[i])
    proc = jnp.concatenate(proc, axis=1)
    stacked_w = relu(proc @ sW1 + sb1) @ sW2 + sb2

    combined = jnp.concatenate([meta_w, regime_w, stacked_w], axis=1)
    final = relu(combined @ cW1 + cb1) @ cW2 + cb2
    sm = jax.nn.softmax(final, axis=1)
    fin = relu(sm @ fW1 + fb1) @ fW2 + fb2
    return sm, fin


# ----------------------------- Main ------------------------------------------
if __name__ == "__main__":
    B, F, H, M, T, R = 8, 16, 32, 4, 8, 4   # hidden_dim divisible by num_models

    key = jax.random.PRNGKey(0)
    k_meta, k_mo, k_mr, k_p = jax.random.split(key, 4)

    meta_features = jax.random.normal(k_meta, (B, F), dtype=jnp.float32)
    model_outputs = jax.random.normal(k_mo, (B, M, T), dtype=jnp.float32)
    regime_logits = jax.random.normal(k_mr, (B, R), dtype=jnp.float32)
    market_regimes = jax.nn.softmax(regime_logits, axis=1)

    params = init_params(k_p, F, H, M, T, R)

    out = meta_learner_forward(meta_features, model_outputs, market_regimes,
                               params, num_models=M, tile_b=8)
    jax.block_until_ready(out)

    ref_w, ref_f = reference_forward(meta_features, model_outputs, market_regimes,
                                     params, M, R)
    assert out["weights"].shape == (B, M)
    assert out["financial_metrics"].shape == (B, 4)
    assert jnp.allclose(out["weights"], ref_w, atol=1e-4, rtol=1e-4)
    assert jnp.allclose(out["financial_metrics"], ref_f, atol=1e-4, rtol=1e-4)

    print("KERNEL_OK")
</pallas_src>

<mosaic_0001>
module attributes {stable_mosaic.version = 11 : i64} {
  func.func @meta_learner_kernel(%arg0: i32, %arg1: memref<3x8x128xf32, #tpu.memory_space<vmem>>, %arg2: memref<17x128x128xf32, #tpu.memory_space<vmem>>, %arg3: memref<16x128xf32, #tpu.memory_space<vmem>>, %arg4: memref<8x128xf32, #tpu.memory_space<vmem>>, %arg5: memref<8x128xf32, #tpu.memory_space<vmem>>) attributes {dimension_semantics = [#tpu.dimension_semantics<parallel>], iteration_bounds = array<i64: 1>, scalar_prefetch = 0 : i64, scratch_operands = 0 : i64, tpu.core_type = #tpu.core_type<tc>, window_params = [{transform_indices = @transform_0, window_bounds = array<i64: 3, 8, 128>}, {pipeline_mode = #tpu.pipeline_mode<synchronous>, transform_indices = @transform_1, window_bounds = array<i64: 17, 128, 128>}, {pipeline_mode = #tpu.pipeline_mode<synchronous>, transform_indices = @transform_2, window_bounds = array<i64: 16, 128>}, {transform_indices = @transform_3, window_bounds = array<i64: 8, 128>}, {transform_indices = @transform_4, window_bounds = array<i64: 8, 128>}]} {
    %c0 = arith.constant 0 : index
    %c0_0 = arith.constant 0 : index
    %c0_1 = arith.constant 0 : index
    %0 = vector.load %arg1[%c0, %c0_0, %c0_1] : memref<3x8x128xf32, #tpu.memory_space<vmem>>, vector<1x8x128xf32>
    %1 = vector.shape_cast %0 : vector<1x8x128xf32> to vector<8x128xf32>
    %c1 = arith.constant 1 : index
    %c0_2 = arith.constant 0 : index
    %c0_3 = arith.constant 0 : index
    %2 = vector.load %arg1[%c1, %c0_2, %c0_3] : memref<3x8x128xf32, #tpu.memory_space<vmem>>, vector<1x8x128xf32>
    %3 = vector.shape_cast %2 : vector<1x8x128xf32> to vector<8x128xf32>
    %c2 = arith.constant 2 : index
    %c0_4 = arith.constant 0 : index
    %c0_5 = arith.constant 0 : index
    %4 = vector.load %arg1[%c2, %c0_4, %c0_5] : memref<3x8x128xf32, #tpu.memory_space<vmem>>, vector<1x8x128xf32>
    %5 = vector.shape_cast %4 : vector<1x8x128xf32> to vector<8x128xf32>
    %c0_6 = arith.constant 0 : index
    %c0_7 = arith.constant 0 : index
    %c0_8 = arith.constant 0 : index
    %6 = vector.load %arg2[%c0_6, %c0_7, %c0_8] : memref<17x128x128xf32, #tpu.memory_space<vmem>>, vector<1x128x128xf32>
    %7 = vector.shape_cast %6 : vector<1x128x128xf32> to vector<128x128xf32>
    %cst = arith.constant dense<0.000000e+00> : vector<8x128xf32>
    %8 = tpu.matmul %1, %7, %cst {dimension_numbers = #tpu.dot_dimension_numbers<[1], [0], [0], [1], [0, 0, 1, 1], [], []>} : vector<8x128xf32>, vector<128x128xf32>, vector<8x128xf32> -> vector<8x128xf32>
    %c0_9 = arith.constant 0 : index
    %c0_10 = arith.constant 0 : index
    %9 = vector.load %arg3[%c0_9, %c0_10] : memref<16x128xf32, #tpu.memory_space<vmem>>, vector<1x128xf32>
    %10 = vector.broadcast %9 : vector<1x128xf32> to vector<8x128xf32>
    %11 = arith.addf %8, %10 : vector<8x128xf32>
    %cst_11 = arith.constant 0.000000e+00 : f32
    %12 = vector.broadcast %cst_11 : f32 to vector<8x128xf32>
    %13 = arith.maximumf %11, %12 : vector<8x128xf32>
    %c1_12 = arith.constant 1 : index
    %c0_13 = arith.constant 0 : index
    %c0_14 = arith.constant 0 : index
    %14 = vector.load %arg2[%c1_12, %c0_13, %c0_14] : memref<17x128x128xf32, #tpu.memory_space<vmem>>, vector<1x128x128xf32>
    %15 = vector.shape_cast %14 : vector<1x128x128xf32> to vector<128x128xf32>
    %cst_15 = arith.constant dense<0.000000e+00> : vector<8x128xf32>
    %16 = tpu.matmul %13, %15, %cst_15 {dimension_numbers = #tpu.dot_dimension_numbers<[1], [0], [0], [1], [0, 0, 1, 1], [], []>} : vector<8x128xf32>, vector<128x128xf32>, vector<8x128xf32> -> vector<8x128xf32>
    %c1_16 = arith.constant 1 : index
    %c0_17 = arith.constant 0 : index
    %17 = vector.load %arg3[%c1_16, %c0_17] : memref<16x128xf32, #tpu.memory_space<vmem>>, vector<1x128xf32>
    %18 = vector.broadcast %17 : vector<1x128xf32> to vector<8x128xf32>
    %19 = arith.addf %16, %18 : vector<8x128xf32>
    %cst_18 = arith.constant 0.000000e+00 : f32
    %20 = vector.broadcast %cst_18 : f32 to vector<8x128xf32>
    %21 = arith.maximumf %19, %20 : vector<8x128xf32>
    %c2_19 = arith.constant 2 : index
    %c0_20 = arith.constant 0 : index
    %c0_21 = arith.constant 0 : index
    %22 = vector.load %arg2[%c2_19, %c0_20, %c0_21] : memref<17x128x128xf32, #tpu.memory_space<vmem>>, vector<1x128x128xf32>
    %23 = vector.shape_cast %22 : vector<1x128x128xf32> to vector<128x128xf32>
    %cst_22 = arith.constant dense<0.000000e+00> : vector<8x128xf32>
    %24 = tpu.matmul %21, %23, %cst_22 {dimension_numbers = #tpu.dot_dimension_numbers<[1], [0], [0], [1], [0, 0, 1, 1], [], []>} : vector<8x128xf32>, vector<128x128xf32>, vector<8x128xf32> -> vector<8x128xf32>
    %c2_23 = arith.constant 2 : index
    %c0_24 = arith.constant 0 : index
    %25 = vector.load %arg3[%c2_23, %c0_24] : memref<16x128xf32, #tpu.memory_space<vmem>>, vector<1x128xf32>
    %26 = vector.broadcast %25 : vector<1x128xf32> to vector<8x128xf32>
    %27 = arith.addf %24, %26 : vector<8x128xf32>
    %c3 = arith.constant 3 : index
    %c0_25 = arith.constant 0 : index
    %c0_26 = arith.constant 0 : index
    %28 = vector.load %arg2[%c3, %c0_25, %c0_26] : memref<17x128x128xf32, #tpu.memory_space<vmem>>, vector<1x128x128xf32>
    %29 = vector.shape_cast %28 : vector<1x128x128xf32> to vector<128x128xf32>
    %cst_27 = arith.constant dense<0.000000e+00> : vector<8x128xf32>
    %30 = tpu.matmul %1, %29, %cst_27 {dimension_numbers = #tpu.dot_dimension_numbers<[1], [0], [0], [1], [0, 0, 1, 1], [], []>} : vector<8x128xf32>, vector<128x128xf32>, vector<8x128xf32> -> vector<8x128xf32>
    %c3_28 = arith.constant 3 : index
    %c0_29 = arith.constant 0 : index
    %31 = vector.load %arg3[%c3_28, %c0_29] : memref<16x128xf32, #tpu.memory_space<vmem>>, vector<1x128xf32>
    %32 = vector.broadcast %31 : vector<1x128xf32> to vector<8x128xf32>
    %33 = arith.addf %30, %32 : vector<8x128xf32>
    %cst_30 = arith.constant 0.000000e+00 : f32
    %34 = vector.broadcast %cst_30 : f32 to vector<8x128xf32>
    %35 = arith.maximumf %33, %34 : vector<8x128xf32>
    %c4 = arith.constant 4 : index
    %c0_31 = arith.constant 0 : index
    %c0_32 = arith.constant 0 : index
    %36 = vector.load %arg2[%c4, %c0_31, %c0_32] : memref<17x128x128xf32, #tpu.memory_space<vmem>>, vector<1x128x128xf32>
    %37 = vector.shape_cast %36 : vector<1x128x128xf32> to vector<128x128xf32>
    %cst_33 = arith.constant dense<0.000000e+00> : vector<8x128xf32>
    %38 = tpu.matmul %5, %37, %cst_33 {dimension_numbers = #tpu.dot_dimension_numbers<[1], [0], [0], [1], [0, 0, 1, 1], [], []>} : vector<8x128xf32>, vector<128x128xf32>, vector<8x128xf32> -> vector<8x128xf32>
    %39 = arith.mulf %35, %38 : vector<8x128xf32>
    %c5 = arith.constant 5 : index
    %c0_34 = arith.constant 0 : index
    %c0_35 = arith.constant 0 : index
    %40 = vector.load %arg2[%c5, %c0_34, %c0_35] : memref<17x128x128xf32, #tpu.memory_space<vmem>>, vector<1x128x128xf32>
    %41 = vector.shape_cast %40 : vector<1x128x128xf32> to vector<128x128xf32>
    %cst_36 = arith.constant dense<0.000000e+00> : vector<8x128xf32>
    %42 = tpu.matmul %39, %41, %cst_36 {dimension_numbers = #tpu.dot_dimension_numbers<[1], [0], [0], [1], [0, 0, 1, 1], [], []>} : vector<8x128xf32>, vector<128x128xf32>, vector<8x128xf32> -> vector<8x128xf32>
    %c6 = arith.constant 6 : index
    %c0_37 = arith.constant 0 : index
    %c0_38 = arith.constant 0 : index
    %43 = vector.load %arg2[%c6, %c0_37, %c0_38] : memref<17x128x128xf32, #tpu.memory_space<vmem>>, vector<1x128x128xf32>
    %44 = vector.shape_cast %43 : vector<1x128x128xf32> to vector<128x128xf32>
    %cst_39 = arith.constant dense<0.000000e+00> : vector<8x128xf32>
    %45 = tpu.matmul %5, %44, %cst_39 {dimension_numbers = #tpu.dot_dimension_numbers<[1], [0], [0], [1], [0, 0, 1, 1], [], []>} : vector<8x128xf32>, vector<128x128xf32>, vector<8x128xf32> -> vector<8x128xf32>
    %46 = arith.addf %42, %45 : vector<8x128xf32>
    %c7 = arith.constant 7 : index
    %c0_40 = arith.constant 0 : index
    %c0_41 = arith.constant 0 : index
    %47 = vector.load %arg2[%c7, %c0_40, %c0_41] : memref<17x128x128xf32, #tpu.memory_space<vmem>>, vector<1x128x128xf32>
    %48 = vector.shape_cast %47 : vector<1x128x128xf32> to vector<128x128xf32>
    %cst_42 = arith.constant dense<0.000000e+00> : vector<8x128xf32>
    %49 = tpu.matmul %3, %48, %cst_42 {dimension_numbers = #tpu.dot_dimension_numbers<[1], [0], [0], [1], [0, 0, 1, 1], [], []>} : vector<8x128xf32>, vector<128x128xf32>, vector<8x128xf32> -> vector<8x128xf32>
    %c4_43 = arith.constant 4 : index
    %c0_44 = arith.constant 0 : index
    %50 = vector.load %arg3[%c4_43, %c0_44] : memref<16x128xf32, #tpu.memory_space<vmem>>, vector<1x128xf32>
    %51 = vector.broadcast %50 : vector<1x128xf32> to vector<8x128xf32>
    %52 = arith.addf %49, %51 : vector<8x128xf32>
    %cst_45 = arith.constant 0.000000e+00 : f32
    %53 = vector.broadcast %cst_45 : f32 to vector<8x128xf32>
    %54 = arith.maximumf %52, %53 : vector<8x128xf32>
    %c8 = arith.constant 8 : index
    %c0_46 = arith.constant 0 : index
    %c0_47 = arith.constant 0 : index
    %55 = vector.load %arg2[%c8, %c0_46, %c0_47] : memref<17x128x128xf32, #tpu.memory_space<vmem>>, vector<1x128x128xf32>
    %56 = vector.shape_cast %55 : vector<1x128x128xf32> to vector<128x128xf32>
    %cst_48 = arith.constant dense<0.000000e+00> : vector<8x128xf32>
    %57 = tpu.matmul %54, %56, %cst_48 {dimension_numbers = #tpu.dot_dimension_numbers<[1], [0], [0], [1], [0, 0, 1, 1], [], []>} : vector<8x128xf32>, vector<128x128xf32>, vector<8x128xf32> -> vector<8x128xf32>
    %c5_49 = arith.constant 5 : index
    %c0_50 = arith.constant 0 : index
    %58 = vector.load %arg3[%c5_49, %c0_50] : memref<16x128xf32, #tpu.memory_space<vmem>>, vector<1x128xf32>
    %59 = vector.broadcast %58 : vector<1x128xf32> to vector<8x128xf32>
    %60 = arith.addf %57, %59 : vector<8x128xf32>
    %c9 = arith.constant 9 : index
    %c0_51 = arith.constant 0 : index
    %c0_52 = arith.constant 0 : index
    %61 = vector.load %arg2[%c9, %c0_51, %c0_52] : memref<17x128x128xf32, #tpu.memory_space<vmem>>, vector<1x128x128xf32>
    %62 = vector.shape_cast %61 : vector<1x128x128xf32> to vector<128x128xf32>
    %cst_53 = arith.constant dense<0.000000e+00> : vector<8x128xf32>
    %63 = tpu.matmul %60, %62, %cst_53 {dimension_numbers = #tpu.dot_dimension_numbers<[1], [0], [0], [1], [0, 0, 1, 1], [], []>} : vector<8x128xf32>, vector<128x128xf32>, vector<8x128xf32> -> vector<8x128xf32>
    %c6_54 = arith.constant 6 : index
    %c0_55 = arith.constant 0 : index
    %64 = vector.load %arg3[%c6_54, %c0_55] : memref<16x128xf32, #tpu.memory_space<vmem>>, vector<1x128xf32>
    %65 = vector.broadcast %64 : vector<1x128xf32> to vector<8x128xf32>
    %66 = arith.addf %63, %65 : vector<8x128xf32>
    %cst_56 = arith.constant 0.000000e+00 : f32
    %67 = vector.broadcast %cst_56 : f32 to vector<8x128xf32>
    %68 = arith.maximumf %66, %67 : vector<8x128xf32>
    %c10 = arith.constant 10 : index
    %c0_57 = arith.constant 0 : index
    %c0_58 = arith.constant 0 : index
    %69 = vector.load %arg2[%c10, %c0_57, %c0_58] : memref<17x128x128xf32, #tpu.memory_space<vmem>>, vector<1x128x128xf32>
    %70 = vector.shape_cast %69 : vector<1x128x128xf32> to vector<128x128xf32>
    %cst_59 = arith.constant dense<0.000000e+00> : vector<8x128xf32>
    %71 = tpu.matmul %68, %70, %cst_59 {dimension_numbers = #tpu.dot_dimension_numbers<[1], [0], [0], [1], [0, 0, 1, 1], [], []>} : vector<8x128xf32>, vector<128x128xf32>, vector<8x128xf32> -> vector<8x128xf32>
    %c7_60 = arith.constant 7 : index
    %c0_61 = arith.constant 0 : index
    %72 = vector.load %arg3[%c7_60, %c0_61] : memref<16x128xf32, #tpu.memory_space<vmem>>, vector<1x128xf32>
    %73 = vector.broadcast %72 : vector<1x128xf32> to vector<8x128xf32>
    %74 = arith.addf %71, %73 : vector<8x128xf32>
    %c11 = arith.constant 11 : index
    %c0_62 = arith.constant 0 : index
    %c0_63 = arith.constant 0 : index
    %75 = vector.load %arg2[%c11, %c0_62, %c0_63] : memref<17x128x128xf32, #tpu.memory_space<vmem>>, vector<1x128x128xf32>
    %76 = vector.shape_cast %75 : vector<1x128x128xf32> to vector<128x128xf32>
    %cst_64 = arith.constant dense<0.000000e+00> : vector<8x128xf32>
    %77 = tpu.matmul %27, %76, %cst_64 {dimension_numbers = #tpu.dot_dimension_numbers<[1], [0], [0], [1], [0, 0, 1, 1], [], []>} : vector<8x128xf32>, vector<128x128xf32>, vector<8x128xf32> -> vector<8x128xf32>
    %c12 = arith.constant 12 : index
    %c0_65 = arith.constant 0 : index
    %c0_66 = arith.constant 0 : index
    %78 = vector.load %arg2[%c12, %c0_65, %c0_66] : memref<17x128x128xf32, #tpu.memory_space<vmem>>, vector<1x128x128xf32>
    %79 = vector.shape_cast %78 : vector<1x128x128xf32> to vector<128x128xf32>
    %cst_67 = arith.constant dense<0.000000e+00> : vector<8x128xf32>
    %80 = tpu.matmul %46, %79, %cst_67 {dimension_numbers = #tpu.dot_dimension_numbers<[1], [0], [0], [1], [0, 0, 1, 1], [], []>} : vector<8x128xf32>, vector<128x128xf32>, vector<8x128xf32> -> vector<8x128xf32>
    %81 = arith.addf %77, %80 : vector<8x128xf32>
    %c13 = arith.constant 13 : index
    %c0_68 = arith.constant 0 : index
    %c0_69 = arith.constant 0 : index
    %82 = vector.load %arg2[%c13, %c0_68, %c0_69] : memref<17x128x128xf32, #tpu.memory_space<vmem>>, vector<1x128x128xf32>
    %83 = vector.shape_cast %82 : vector<1x128x128xf32> to vector<128x128xf32>
    %cst_70 = arith.constant dense<0.000000e+00> : vector<8x128xf32>
    %84 = tpu.matmul %74, %83, %cst_70 {dimension_numbers = #tpu.dot_dimension_numbers<[1], [0], [0], [1], [0, 0, 1, 1], [], []>} : vector<8x128xf32>, vector<128x128xf32>, vector<8x128xf32> -> vector<8x128xf32>
    %85 = arith.addf %81, %84 : vector<8x128xf32>
    %c8_71 = arith.constant 8 : index
    %c0_72 = arith.constant 0 : index
    %86 = vector.load %arg3[%c8_71, %c0_72] : memref<16x128xf32, #tpu.memory_space<vmem>>, vector<1x128xf32>
    %87 = vector.broadcast %86 : vector<1x128xf32> to vector<8x128xf32>
    %88 = arith.addf %85, %87 : vector<8x128xf32>
    %cst_73 = arith.constant 0.000000e+00 : f32
    %89 = vector.broadcast %cst_73 : f32 to vector<8x128xf32>
    %90 = arith.maximumf %88, %89 : vector<8x128xf32>
    %c14 = arith.constant 14 : index
    %c0_74 = arith.constant 0 : index
    %c0_75 = arith.constant 0 : index
    %91 = vector.load %arg2[%c14, %c0_74, %c0_75] : memref<17x128x128xf32, #tpu.memory_space<vmem>>, vector<1x128x128xf32>
    %92 = vector.shape_cast %91 : vector<1x128x128xf32> to vector<128x128xf32>
    %cst_76 = arith.constant dense<0.000000e+00> : vector<8x128xf32>
    %93 = tpu.matmul %90, %92, %cst_76 {dimension_numbers = #tpu.dot_dimension_numbers<[1], [0], [0], [1], [0, 0, 1, 1], [], []>} : vector<8x128xf32>, vector<128x128xf32>, vector<8x128xf32> -> vector<8x128xf32>
    %c9_77 = arith.constant 9 : index
    %c0_78 = arith.constant 0 : index
    %94 = vector.load %arg3[%c9_77, %c0_78] : memref<16x128xf32, #tpu.memory_space<vmem>>, vector<1x128xf32>
    %95 = vector.broadcast %94 : vector<1x128xf32> to vector<8x128xf32>
    %96 = arith.addf %93, %95 : vector<8x128xf32>
    %97 = tpu.iota {dimensions = array<i32: 1>} : vector<8x128xi32>
    %c4_i32 = arith.constant 4 : i32
    %98 = vector.broadcast %c4_i32 : i32 to vector<8x128xi32>
    %99 = arith.cmpi slt, %97, %98 : vector<8x128xi32>
    %cst_79 = arith.constant -1.000000e+30 : f32
    %100 = vector.broadcast %cst_79 : f32 to vector<8x128xf32>
    %101 = arith.select %99, %96, %100 : vector<8x128xi1>, vector<8x128xf32>
    %cst_80 = arith.constant dense<0xFF800000> : vector<8xf32>
    %102 = vector.multi_reduction <maximumf>, %101, %cst_80 [1] : vector<8x128xf32> to vector<8xf32>
    %103 = vector.shape_cast %102 : vector<8xf32> to vector<8x1xf32>
    %104 = vector.broadcast %103 : vector<8x1xf32> to vector<8x128xf32>
    %105 = arith.subf %101, %104 : vector<8x128xf32>
    %106 = math.exp %105 : vector<8x128xf32>
    %cst_81 = arith.constant dense<0.000000e+00> : vector<8xf32>
    %107 = vector.multi_reduction <add>, %106, %cst_81 [1] : vector<8x128xf32> to vector<8xf32>
    %108 = vector.shape_cast %107 : vector<8xf32> to vector<8x1xf32>
    %109 = vector.broadcast %108 : vector<8x1xf32> to vector<8x128xf32>
    %110 = arith.divf %106, %109 : vector<8x128xf32>
    %c0_82 = arith.constant 0 : index
    %c0_83 = arith.constant 0 : index
    %111 = vector.load %arg4[%c0_82, %c0_83] : memref<8x128xf32, #tpu.memory_space<vmem>>, vector<8x128xf32>
    tpu.vector_store %arg4[%c0_82, %c0_83], %110 {strides = array<i32>} : memref<8x128xf32, #tpu.memory_space<vmem>>, vector<8x128xf32>,
    %c15 = arith.constant 15 : index
    %c0_84 = arith.constant 0 : index
    %c0_85 = arith.constant 0 : index
    %112 = vector.load %arg2[%c15, %c0_84, %c0_85] : memref<17x128x128xf32, #tpu.memory_space<vmem>>, vector<1x128x128xf32>
    %113 = vector.shape_cast %112 : vector<1x128x128xf32> to vector<128x128xf32>
    %cst_86 = arith.constant dense<0.000000e+00> : vector<8x128xf32>
    %114 = tpu.matmul %110, %113, %cst_86 {dimension_numbers = #tpu.dot_dimension_numbers<[1], [0], [0], [1], [0, 0, 1, 1], [], []>} : vector<8x128xf32>, vector<128x128xf32>, vector<8x128xf32> -> vector<8x128xf32>
    %c10_87 = arith.constant 10 : index
    %c0_88 = arith.constant 0 : index
    %115 = vector.load %arg3[%c10_87, %c0_88] : memref<16x128xf32, #tpu.memory_space<vmem>>, vector<1x128xf32>
    %116 = vector.broadcast %115 : vector<1x128xf32> to vector<8x128xf32>
    %117 = arith.addf %114, %116 : vector<8x128xf32>
    %cst_89 = arith.constant 0.000000e+00 : f32
    %118 = vector.broadcast %cst_89 : f32 to vector<8x128xf32>
    %119 = arith.maximumf %117, %118 : vector<8x128xf32>
    %c16 = arith.constant 16 : index
    %c0_90 = arith.constant 0 : index
    %c0_91 = arith.constant 0 : index
    %120 = vector.load %arg2[%c16, %c0_90, %c0_91] : memref<17x128x128xf32, #tpu.memory_space<vmem>>, vector<1x128x128xf32>
    %121 = vector.shape_cast %120 : vector<1x128x128xf32> to vector<128x128xf32>
    %cst_92 = arith.constant dense<0.000000e+00> : vector<8x128xf32>
    %122 = tpu.matmul %119, %121, %cst_92 {dimension_numbers = #tpu.dot_dimension_numbers<[1], [0], [0], [1], [0, 0, 1, 1], [], []>} : vector<8x128xf32>, vector<128x128xf32>, vector<8x128xf32> -> vector<8x128xf32>
    %c11_93 = arith.constant 11 : index
    %c0_94 = arith.constant 0 : index
    %123 = vector.load %arg3[%c11_93, %c0_94] : memref<16x128xf32, #tpu.memory_space<vmem>>, vector<1x128xf32>
    %124 = vector.broadcast %123 : vector<1x128xf32> to vector<8x128xf32>
    %125 = arith.addf %122, %124 : vector<8x128xf32>
    %c0_95 = arith.constant 0 : index
    %c0_96 = arith.constant 0 : index
    %126 = vector.load %arg5[%c0_95, %c0_96] : memref<8x128xf32, #tpu.memory_space<vmem>>, vector<8x128xf32>
    tpu.vector_store %arg5[%c0_95, %c0_96], %125 {strides = array<i32>} : memref<8x128xf32, #tpu.memory_space<vmem>>, vector<8x128xf32>,
    return
  }
  func.func @transform_0(%arg0: i32) -> (i32, i32, i32) {
    %c0_i32 = arith.constant 0 : i32
    %c0_i32_0 = arith.constant 0 : i32
    %c0_i32_1 = arith.constant 0 : i32
    return %c0_i32, %arg0, %c0_i32_0 : i32, i32, i32
  }
  func.func @transform_1(%arg0: i32) -> (i32, i32, i32) {
    %c0_i32 = arith.constant 0 : i32
    %c0_i32_0 = arith.constant 0 : i32
    %c0_i32_1 = arith.constant 0 : i32
    %c0_i32_2 = arith.constant 0 : i32
    return %c0_i32, %c0_i32_0, %c0_i32_1 : i32, i32, i32
  }
  func.func @transform_2(%arg0: i32) -> (i32, i32) {
    %c0_i32 = arith.constant 0 : i32
    %c0_i32_0 = arith.constant 0 : i32
    %c0_i32_1 = arith.constant 0 : i32
    return %c0_i32, %c0_i32_0 : i32, i32
  }
  func.func @transform_3(%arg0: i32) -> (i32, i32) {
    %c0_i32 = arith.constant 0 : i32
    %c0_i32_0 = arith.constant 0 : i32
    return %arg0, %c0_i32 : i32, i32
  }
  func.func @transform_4(%arg0: i32) -> (i32, i32) {
    %c0_i32 = arith.constant 0 : i32
    %c0_i32_0 = arith.constant 0 : i32
    return %arg0, %c0_i32 : i32, i32
  }
}

</mosaic_0001>

<bundles_post_ra>
// kernel: tpu_custom_call.1
= control target key start
LH: loop header
LB: loop body
LE: loop exit
PB: predicated region body
PF: predicated region fallthrough
CT: control target
= control target key end

     0   :  { %10 = vsyncpa [#allocation3], 0  ;;  %s1003_s0 = inlined_call_operand.hbm [shape: f32[3,8,128], index: 0, kind: input, shape index: {}]   ;;  %s1004_s1 = inlined_call_operand.hbm [shape: f32[17,128,128], index: 1, kind: input, shape index: {}]   ;;  %s1005_s2 = inlined_call_operand.hbm [shape: f32[16,128], index: 2, kind: input, shape index: {}]   ;;  %s1006_s3 = inlined_call_operand.hbm [shape: f32[8,128], index: 3, kind: output, shape index: {0}]   ;;  %s1007_s4 = inlined_call_operand.hbm [shape: f32[8,128], index: 4, kind: output, shape index: {1}]  }
   0x1   :  { %11 = vsyncpa [#allocation6], 0 }
   0x2   :  { %12 = vsyncpa [#allocation4], 0 }
   0x3   :  { %13 = vsyncpa [#allocation10], 0  ;;  %s31_s17 = sshll.u32 %s1004_s1, 4  ;;  %s945_s18 = smov [#allocation5]   ;;  %s32_s17 = int_to_ptr.hbm [resolvable:$true] %s31_s17 }
   0x4   :  { %s33_s19 = sshll.u32 %s945_s18, 4  ;;  %s18_s22 = sshll.u32 %s1003_s0, 4  ;;  %s34_s19 = int_to_ptr.vmem [resolvable:$true] %s33_s19  ;;  %s19_s22 = int_to_ptr.hbm [resolvable:$true] %s18_s22 }
   0x5   :  { %s946_s23 = smov 128   ;;  %s947_s24 = smov 8  }
   0x6   :  { %39 = dma.hbm_to_vmem [thread:$0]  %s32_s17, 34816, %s34_s19, [#allocation6], %s946_s23, %s946_s23, %s947_s24  }
   0x7   :  { %s948_s25 = smov [#allocation2]   ;;  %s44_s29 = sshll.u32 %s1005_s2, 4  ;;  %s45_s29 = int_to_ptr.hbm [resolvable:$true] %s44_s29 }
   0x8   :  { %s20_s26 = sshll.u32 %s948_s25, 4  ;;  %s949_s1 = smov [#allocation7]   ;;  %s21_s26 = int_to_ptr.vmem [resolvable:$true] %s20_s26 }
   0x9   :  { %26 = dma.hbm_to_vmem [thread:$0]  %s19_s22, 384, %s21_s26, [#allocation3], %s946_s23, %s946_s23, %s947_s24  }
   0xa   :  { %s46_s30 = sshll.u32 %s949_s1, 4  ;;  %s47_s30 = int_to_ptr.vmem [resolvable:$true] %s46_s30 }
   0xb   :  { %52 = dma.hbm_to_vmem [thread:$0]  %s45_s29, 256, %s47_s30, [#allocation6], %s946_s23, %s946_s23, %s947_s24  }
   0xc   :  { %937 = dma.done.wait [#allocation3], 384  }
   0xd   :  { %938 = vsyncadd [#allocation3], 4294966912 }
   0xe   :  { %939 = dma.done.wait [#allocation6], 35072  }
   0xf   :  { %940 = vsyncadd [#allocation6], 4294932224  ;;  %v85_v0 = vld [vmem:[#allocation5 + $0x78] sm:$0xff]  ;;  %v84_v2 = vld [vmem:[#allocation5 + $0x70] sm:$0xff]  ;;  %s950_s0 = smov [#allocation8]   ;;  %s767_s7 = sshll.u32 %s1006_s3, 4  ;;  %s768_s7 = int_to_ptr.hbm [resolvable:$true] %s767_s7 }
  0x10   :  { %v204_v1 = vld [vmem:[#allocation5 + $0x1f8] sm:$0xff]  ;;  %88 = vmatpush.msra.mxu0 %v85_v0  ;;  %v203_v3 = vld [vmem:[#allocation5 + $0x1f0] sm:$0xff]  ;;  %v83_v4 = vld [vmem:[#allocation5 + $0x68] sm:$0xff]  ;;  %s765_s2 = sshll.u32 %s950_s0, 4  ;;  %s951_s8 = smov [#allocation9]   ;;  %s766_s2 = int_to_ptr.vmem [resolvable:$true] %s765_s2 }
  0x11   :  { %207 = vmatpush.msra.mxu3 %v204_v1  ;;  %v202_v5 = vld [vmem:[#allocation5 + $0x1e8] sm:$0xff]  ;;  %v82_v6 = vld [vmem:[#allocation5 + $0x60] sm:$0xff]  ;;  %v81_v8 = vld [vmem:[#allocation5 + $0x58] sm:$0xff]  ;;  %s776_s9 = sshll.u32 %s951_s8, 4  ;;  %s778_s12 = sshll.u32 %s1007_s4, 4  ;;  %s777_s9 = int_to_ptr.vmem [resolvable:$true] %s776_s9  ;;  %s779_s12 = int_to_ptr.hbm [resolvable:$true] %s778_s12 }
  0x12   :  { %89 = vmatpush.msra.mxu0 %v84_v2  ;;  %v201_v7 = vld [vmem:[#allocation5 + $0x1e0] sm:$0xff]  ;;  %v200_v9 = vld [vmem:[#allocation5 + $0x1d8] sm:$0xff]  ;;  %v80_v10 = vld [vmem:[#allocation5 + $0x50] sm:$0xff] }
  0x13   :  { %208 = vmatpush.msra.mxu3 %v203_v3  ;;  %v199_v11 = vld [vmem:[#allocation5 + $0x1d0] sm:$0xff]  ;;  %v79_v12 = vld [vmem:[#allocation5 + $0x48] sm:$0xff]  ;;  %v78_v14 = vld [vmem:[#allocation5 + $0x40] sm:$0xff] }
  0x14   :  { %90 = vmatpush.msra.mxu0 %v83_v4  ;;  %v198_v13 = vld [vmem:[#allocation5 + $0x1c8] sm:$0xff]  ;;  %v197_v15 = vld [vmem:[#allocation5 + $0x1c0] sm:$0xff]  ;;  %v77_v16 = vld [vmem:[#allocation5 + $0x38] sm:$0xff] }
  0x15   :  { %209 = vmatpush.msra.mxu3 %v202_v5  ;;  %v196_v17 = vld [vmem:[#allocation5 + $0x1b8] sm:$0xff]  ;;  %v76_v18 = vld [vmem:[#allocation5 + $0x30] sm:$0xff]  ;;  %v75_v20 = vld [vmem:[#allocation5 + $0x28] sm:$0xff] }
  0x16   :  { %91 = vmatpush.msra.mxu0 %v82_v6  ;;  %v195_v19 = vld [vmem:[#allocation5 + $0x1b0] sm:$0xff]  ;;  %v194_v21 = vld [vmem:[#allocation5 + $0x1a8] sm:$0xff]  ;;  %v74_v22 = vld [vmem:[#allocation5 + $0x20] sm:$0xff] }
  0x17   :  { %210 = vmatpush.msra.mxu3 %v201_v7  ;;  %v193_v23 = vld [vmem:[#allocation5 + $0x1a0] sm:$0xff]  ;;  %v73_v24 = vld [vmem:[#allocation5 + $0x18] sm:$0xff]  ;;  %v72_v26 = vld [vmem:[#allocation5 + $0x10] sm:$0xff] }
  0x18   :  { %92 = vmatpush.msra.mxu0 %v81_v8  ;;  %v192_v25 = vld [vmem:[#allocation5 + $0x198] sm:$0xff]  ;;  %v191_v27 = vld [vmem:[#allocation5 + $0x190] sm:$0xff]  ;;  %v71_v28 = vld [vmem:[#allocation5 + $0x8] sm:$0xff] }
  0x19   :  { %211 = vmatpush.msra.mxu3 %v200_v9  ;;  %v190_v29 = vld [vmem:[#allocation5 + $0x188] sm:$0xff]  ;;  %v70_v30 = vld [vmem:[#allocation5] sm:$0xff]  ;;  %v356_v33 = vld [vmem:[#allocation5 + $0x3f8] sm:$0xff] }
  0x1a   :  { %93 = vmatpush.msra.mxu0 %v80_v10  ;;  %v189_v31 = vld [vmem:[#allocation5 + $0x180] sm:$0xff]  ;;  %v65_v32 = vld [vmem:[#allocation2] sm:$0xff]  ;;  %v244_v34 = vld [vmem:[#allocation5 + $0x278] sm:$0xff] }
  0x1b   :  { %212 = vmatpush.msra.mxu3 %v199_v11  ;;  %v355_v35 = vld [vmem:[#allocation5 + $0x3f0] sm:$0xff]  ;;  %v125_v37 = vld [vmem:[#allocation5 + $0xf8] sm:$0xff]  ;;  %v354_v38 = vld [vmem:[#allocation5 + $0x3e8] sm:$0xff] }
  0x1c   :  { %94 = vmatpush.msra.mxu0 %v79_v12  ;;  %v243_v36 = vld [vmem:[#allocation5 + $0x270] sm:$0xff]  ;;  %v242_v40 = vld [vmem:[#allocation5 + $0x268] sm:$0xff]  ;;  %128 = vmatpush.msra.mxu1 %v125_v37  ;;  %v353_v41 = vld [vmem:[#allocation5 + $0x3e0] sm:$0xff] }
  0x1d   :  { %213 = vmatpush.msra.mxu3 %v198_v13  ;;  %v124_v39 = vld [vmem:[#allocation5 + $0xf0] sm:$0xff]  ;;  %v123_v42 = vld [vmem:[#allocation5 + $0xe8] sm:$0xff]  ;;  %v241_v43 = vld [vmem:[#allocation5 + $0x260] sm:$0xff] }
  0x1e   :  { %95 = vmatpush.msra.mxu0 %v78_v14  ;;  %129 = vmatpush.msra.mxu1 %v124_v39  ;;  %v352_v44 = vld [vmem:[#allocation5 + $0x3d8] sm:$0xff]  ;;  %v122_v45 = vld [vmem:[#allocation5 + $0xe0] sm:$0xff]  ;;  %v351_v47 = vld [vmem:[#allocation5 + $0x3d0] sm:$0xff] }
  0x1f   :  { %214 = vmatpush.msra.mxu3 %v197_v15  ;;  %v240_v46 = vld [vmem:[#allocation5 + $0x258] sm:$0xff]  ;;  %v239_v49 = vld [vmem:[#allocation5 + $0x250] sm:$0xff]  ;;  %v350_v50 = vld [vmem:[#allocation5 + $0x3c8] sm:$0xff] }
  0x20   :  { %96 = vmatpush.msra.mxu0 %v77_v16  ;;  %130 = vmatpush.msra.mxu1 %v123_v42  ;;  %v121_v48 = vld [vmem:[#allocation5 + $0xd8] sm:$0xff]  ;;  %v120_v51 = vld [vmem:[#allocation5 + $0xd0] sm:$0xff]  ;;  %v238_v52 = vld [vmem:[#allocation5 + $0x248] sm:$0xff] }
  0x21   :  { %215 = vmatpush.msra.mxu3 %v196_v17  ;;  %v349_v53 = vld [vmem:[#allocation5 + $0x3c0] sm:$0xff]  ;;  %v119_v54 = vld [vmem:[#allocation5 + $0xc8] sm:$0xff]  ;;  %v348_v56 = vld [vmem:[#allocation5 + $0x3b8] sm:$0xff] }
  0x22   :  { %97 = vmatpush.msra.mxu0 %v76_v18  ;;  %131 = vmatpush.msra.mxu1 %v122_v45  ;;  %v237_v55 = vld [vmem:[#allocation5 + $0x240] sm:$0xff]  ;;  %v236_v58 = vld [vmem:[#allocation5 + $0x238] sm:$0xff]  ;;  %v347_v59 = vld [vmem:[#allocation5 + $0x3b0] sm:$0xff] }
  0x23   :  { %216 = vmatpush.msra.mxu3 %v195_v19  ;;  %v118_v57 = vld [vmem:[#allocation5 + $0xc0] sm:$0xff]  ;;  %v117_v60 = vld [vmem:[#allocation5 + $0xb8] sm:$0xff]  ;;  %v235_v61 = vld [vmem:[#allocation5 + $0x230] sm:$0xff] }
  0x24   :  { %98 = vmatpush.msra.mxu0 %v75_v20  ;;  %132 = vmatpush.msra.mxu1 %v121_v48  ;;  %v346_v62 = vld [vmem:[#allocation5 + $0x3a8] sm:$0xff]  ;;  %v116_v63 = vld [vmem:[#allocation5 + $0xb0] sm:$0xff]  ;;  %v345_v1 = vld [vmem:[#allocation5 + $0x3a0] sm:$0xff] }
  0x25   :  { %217 = vmatpush.msra.mxu3 %v194_v21  ;;  %v234_v0 = vld [vmem:[#allocation5 + $0x228] sm:$0xff]  ;;  %v233_v3 = vld [vmem:[#allocation5 + $0x220] sm:$0xff]  ;;  %v344_v4 = vld [vmem:[#allocation5 + $0x398] sm:$0xff] }
  0x26   :  { %99 = vmatpush.msra.mxu0 %v74_v22  ;;  %133 = vmatpush.msra.mxu1 %v120_v51  ;;  %v115_v2 = vld [vmem:[#allocation5 + $0xa8] sm:$0xff]  ;;  %v114_v5 = vld [vmem:[#allocation5 + $0xa0] sm:$0xff]  ;;  %v232_v6 = vld [vmem:[#allocation5 + $0x218] sm:$0xff] }
  0x27   :  { %218 = vmatpush.msra.mxu3 %v193_v23  ;;  %v343_v7 = vld [vmem:[#allocation5 + $0x390] sm:$0xff]  ;;  %v113_v8 = vld [vmem:[#allocation5 + $0x98] sm:$0xff]  ;;  %v342_v10 = vld [vmem:[#allocation5 + $0x388] sm:$0xff] }
  0x28   :  { %100 = vmatpush.msra.mxu0 %v73_v24  ;;  %134 = vmatpush.msra.mxu1 %v119_v54  ;;  %v231_v9 = vld [vmem:[#allocation5 + $0x210] sm:$0xff]  ;;  %v230_v11 = vld [vmem:[#allocation5 + $0x208] sm:$0xff]  ;;  %v341_v12 = vld [vmem:[#allocation5 + $0x380] sm:$0xff] }
  0x29   :  { %219 = vmatpush.msra.mxu3 %v192_v25  ;;  %v67_v13 = vld [vmem:[#allocation2 + $0x8] sm:$0xff]  ;;  %v229_v14 = vld [vmem:[#allocation5 + $0x200] sm:$0xff]  ;;  %v986_v15 = vld [vmem:[#allocation2 + $0x10] sm:$0xff] }
  0x2a   :  { %101 = vmatpush.msra.mxu0 %v72_v26  ;;  %135 = vmatpush.msra.mxu1 %v118_v57  ;;  %v112_v16 = vld [vmem:[#allocation5 + $0x90] sm:$0xff]  ;;  %v111_v17 = vld [vmem:[#allocation5 + $0x88] sm:$0xff]  ;;  %v110_v18 = vld [vmem:[#allocation5 + $0x80] sm:$0xff] }
  0x2b   :  { %220 = vmatpush.msra.mxu3 %v191_v27  ;;  %v396_v19 = vld [vmem:[#allocation5 + $0x478] sm:$0xff]  ;;  %v395_v20 = vld [vmem:[#allocation5 + $0x470] sm:$0xff]  ;;  %v394_v21 = vld [vmem:[#allocation5 + $0x468] sm:$0xff] }
  0x2c   :  { %102 = vmatpush.msra.mxu0 %v71_v28  ;;  %136 = vmatpush.msra.mxu1 %v117_v60  ;;  %v393_v22 = vld [vmem:[#allocation5 + $0x460] sm:$0xff]  ;;  %v392_v23 = vld [vmem:[#allocation5 + $0x458] sm:$0xff]  ;;  %v391_v24 = vld [vmem:[#allocation5 + $0x450] sm:$0xff] }
  0x2d   :  { %221 = vmatpush.msra.mxu3 %v190_v29  ;;  %v390_v25 = vld [vmem:[#allocation5 + $0x448] sm:$0xff]  ;;  %v389_v26 = vld [vmem:[#allocation5 + $0x440] sm:$0xff]  ;;  %v388_v27 = vld [vmem:[#allocation5 + $0x438] sm:$0xff] }
  0x2e   :  { %103 = vmatpush.msra.mxu0 %v70_v30  ;;  %137 = vmatpush.msra.mxu1 %v116_v63  ;;  %v387_v28 = vld [vmem:[#allocation5 + $0x430] sm:$0xff]  ;;  %v386_v29 = vld [vmem:[#allocation5 + $0x428] sm:$0xff]  ;;  %v801_v30 = vld [vmem:[#allocation7] ss:$0 sm:$0xff] }
  0x2f   :  { %222 = vmatpush.msra.mxu3 %v189_v31  ;;  %104 = vmatmul.f32.vlgmr.msra.gmra.mxu0 %v65_v32  ;;  %v382_v37 = vld [vmem:[#allocation5 + $0x408] sm:$0xff]  ;;  %v165_v39 = vld [vmem:[#allocation5 + $0x178] sm:$0xff]  ;;  %v162_v42 = vld [vmem:[#allocation5 + $0x160] sm:$0xff] }
  0x30   :  { %245 = vmatpush.msrb.mxu0 %v244_v34  ;;  %223 = vmatmul.f32.vlgmr.msra.gmra.mxu3 %v65_v32  ;;  %v385_v32 = vld [vmem:[#allocation5 + $0x420] sm:$0xff]  ;;  %v384_v34 = vld [vmem:[#allocation5 + $0x418] sm:$0xff]  ;;  %v293_v54 = vld [vmem:[#allocation5 + $0x348] sm:$0xff] }
  0x31   :  { %359 = vmatpush.msrb.mxu3 %v356_v33  ;;  %138 = vmatpush.msra.mxu1 %v115_v2  ;;  %v161_v45 = vld [vmem:[#allocation5 + $0x158] sm:$0xff]  ;;  %v296_v48 = vld [vmem:[#allocation5 + $0x360] sm:$0xff]  ;;  %v289_v63 = vld [vmem:[#allocation5 + $0x328] sm:$0xff] }
  0x32   :  { %246 = vmatpush.msrb.mxu0 %v243_v36  ;;  %v383_v36 = vld [vmem:[#allocation5 + $0x410] sm:$0xff]  ;;  %168 = vmatpush.msra.mxu2 %v165_v39  ;;  %v158_v51 = vld [vmem:[#allocation5 + $0x140] sm:$0xff]  ;;  %v151_v2 = vld [vmem:[#allocation5 + $0x108] sm:$0xff] }
  0x33   :  { %360 = vmatpush.msrb.mxu3 %v355_v35  ;;  %139 = vmatpush.msra.mxu1 %v114_v5  ;;  %v154_v60 = vld [vmem:[#allocation5 + $0x120] sm:$0xff]  ;;  %v425_v39 = vld [vmem:[#allocation5 + $0x4a8] sm:$0xff] }
  0x34   :  { %247 = vmatpush.msrb.mxu0 %v242_v40  ;;  %v164_v40 = vld [vmem:[#allocation5 + $0x170] sm:$0xff]  ;;  %v150_v5 = vld [vmem:[#allocation5 + $0x100] sm:$0xff] }
  0x35   :  { %361 = vmatpush.msrb.mxu3 %v354_v38  ;;  %140 = vmatpush.msra.mxu1 %v113_v8  ;;  %v381_v38 = vld [vmem:[#allocation5 + $0x400] sm:$0xff]  ;;  %v281_v8 = vld [vmem:[#allocation5 + $0x2f0] sm:$0xff] }
  0x36   :  { %248 = vmatpush.msrb.mxu0 %v241_v43  ;;  %169 = vmatpush.msra.mxu2 %v164_v40  ;;  %v299_v43 = vld [vmem:[#allocation5 + $0x378] sm:$0xff]  ;;  %v804_v40 = vld [vmem:[#allocation7 + $0x1] ss:$0 sm:$0xff] }
  0x37   :  { %362 = vmatpush.msrb.mxu3 %v353_v41  ;;  %141 = vmatpush.msra.mxu1 %v112_v16  ;;  %v163_v41 = vld [vmem:[#allocation5 + $0x168] sm:$0xff]  ;;  %v274_v16 = vld [vmem:[#allocation5 + $0x2b8] sm:$0xff] }
  0x38   :  { %249 = vmatpush.msrb.mxu0 %v240_v46  ;;  %170 = vmatpush.msra.mxu2 %v163_v41  ;;  %v297_v46 = vld [vmem:[#allocation5 + $0x368] sm:$0xff]  ;;  %v423_v41 = vld [vmem:[#allocation5 + $0x498] sm:$0xff] }
  0x39   :  { %363 = vmatpush.msrb.mxu3 %v352_v44  ;;  %142 = vmatpush.msra.mxu1 %v111_v17  ;;  %v298_v44 = vld [vmem:[#allocation5 + $0x370] sm:$0xff]  ;;  %v288_v17 = vld [vmem:[#allocation5 + $0x320] sm:$0xff] }
  0x3a   :  { %250 = vmatpush.msrb.mxu0 %v239_v49  ;;  %171 = vmatpush.msra.mxu2 %v162_v42  ;;  %v159_v49 = vld [vmem:[#allocation5 + $0x148] sm:$0xff]  ;;  %v802_v42 = vld [vmem:[#allocation7 + $0x3] ss:$0 sm:$0xff] }
  0x3b   :  { %364 = vmatpush.msrb.mxu3 %v351_v47  ;;  %143 = vmatpush.msra.mxu1 %v110_v18  ;;  %v160_v47 = vld [vmem:[#allocation5 + $0x150] sm:$0xff] }
  0x3c   :  { %251 = vmatpush.msrb.mxu0 %v238_v52  ;;  %172 = vmatpush.msra.mxu2 %v161_v45  ;;  %v294_v52 = vld [vmem:[#allocation5 + $0x350] sm:$0xff] }
  0x3d   :  { %365 = vmatpush.msrb.mxu3 %v350_v50  ;;  %300 = vmatpush.msrb.mxu1 %v299_v43  ;;  %v295_v50 = vld [vmem:[#allocation5 + $0x358] sm:$0xff]  ;;  %v273_v18 = vld [vmem:[#allocation5 + $0x2b0] sm:$0xff] }
  0x3e   :  { %252 = vmatpush.msrb.mxu0 %v237_v55  ;;  %173 = vmatpush.msra.mxu2 %v160_v47  ;;  %v156_v55 = vld [vmem:[#allocation5 + $0x130] sm:$0xff] }
  0x3f   :  { %366 = vmatpush.msrb.mxu3 %v349_v53  ;;  %301 = vmatpush.msrb.mxu1 %v298_v44  ;;  %v157_v53 = vld [vmem:[#allocation5 + $0x138] sm:$0xff]  ;;  %v422_v44 = vld [vmem:[#allocation5 + $0x490] sm:$0xff] }
  0x40   :  { %253 = vmatpush.msrb.mxu0 %v236_v58  ;;  %174 = vmatpush.msra.mxu2 %v159_v49  ;;  %v155_v58 = vld [vmem:[#allocation5 + $0x128] sm:$0xff]  ;;  %v420_v49 = vld [vmem:[#allocation5 + $0x480] sm:$0xff] }
  0x41   :  { %367 = vmatpush.msrb.mxu3 %v348_v56  ;;  %302 = vmatpush.msrb.mxu1 %v297_v46  ;;  %v292_v56 = vld [vmem:[#allocation5 + $0x340] sm:$0xff] }
  0x42   :  { %254 = vmatpush.msrb.mxu0 %v235_v61  ;;  %175 = vmatpush.msra.mxu2 %v158_v51  ;;  %v290_v61 = vld [vmem:[#allocation5 + $0x330] sm:$0xff] }
  0x43   :  { %368 = vmatpush.msrb.mxu3 %v347_v59  ;;  %303 = vmatpush.msrb.mxu1 %v296_v48  ;;  %v291_v59 = vld [vmem:[#allocation5 + $0x338] sm:$0xff]  ;;  %v421_v48 = vld [vmem:[#allocation5 + $0x488] sm:$0xff] }
  0x44   :  { %255 = vmatpush.msrb.mxu0 %v234_v0  ;;  %176 = vmatpush.msra.mxu2 %v157_v53  ;;  %v803_v0 = vld [vmem:[#allocation7 + $0x4] ss:$0 sm:$0xff]  ;;  %v530_v53 = vld [vmem:[#allocation5 + $0x670] sm:$0xff] }
  0x45   :  { %369 = vmatpush.msrb.mxu3 %v346_v62  ;;  %304 = vmatpush.msrb.mxu1 %v295_v50  ;;  %v153_v62 = vld [vmem:[#allocation5 + $0x118] sm:$0xff] }
  0x46   :  { %256 = vmatpush.msrb.mxu0 %v233_v3  ;;  %177 = vmatpush.msra.mxu2 %v156_v55  ;;  %v529_v55 = vld [vmem:[#allocation5 + $0x668] sm:$0xff] }
  0x47   :  { %370 = vmatpush.msrb.mxu3 %v345_v1  ;;  %305 = vmatpush.msrb.mxu1 %v294_v52  ;;  %v152_v1 = vld [vmem:[#allocation5 + $0x110] sm:$0xff]  ;;  %v531_v52 = vld [vmem:[#allocation5 + $0x678] sm:$0xff] }
  0x48   :  { %257 = vmatpush.msrb.mxu0 %v232_v6  ;;  %178 = vmatpush.msra.mxu2 %v155_v58  ;;  %v282_v6 = vld [vmem:[#allocation5 + $0x2f8] sm:$0xff] }
  0x49   :  { %371 = vmatpush.msrb.mxu3 %v344_v4  ;;  %306 = vmatpush.msrb.mxu1 %v293_v54  ;;  %v514_v54 = vld [vmem:[#allocation5 + $0x5f8] sm:$0xff] }
  0x4a   :  { %258 = vmatpush.msrb.mxu0 %v231_v9  ;;  %179 = vmatpush.msra.mxu2 %v154_v60  ;;  %v280_v9 = vld [vmem:[#allocation5 + $0x2e8] sm:$0xff]  ;;  %v511_v60 = vld [vmem:[#allocation5 + $0x5e0] sm:$0xff] }
  0x4b   :  { %372 = vmatpush.msrb.mxu3 %v343_v7  ;;  %307 = vmatpush.msrb.mxu1 %v292_v56  ;;  %v513_v56 = vld [vmem:[#allocation5 + $0x5f0] sm:$0xff] }
  0x4c   :  { %259 = vmatpush.msrb.mxu0 %v230_v11  ;;  %180 = vmatpush.msra.mxu2 %v153_v62  ;;  %v278_v11 = vld [vmem:[#allocation5 + $0x2d8] sm:$0xff] }
  0x4d   :  { %373 = vmatpush.msrb.mxu3 %v342_v10  ;;  %308 = vmatpush.msrb.mxu1 %v291_v59  ;;  %v279_v10 = vld [vmem:[#allocation5 + $0x2e0] sm:$0xff]  ;;  %v512_v59 = vld [vmem:[#allocation5 + $0x5e8] sm:$0xff]  ;;  %v510_v62 = vld [vmem:[#allocation5 + $0x5d8] sm:$0xff] }
  0x4e   :  { %260 = vmatpush.msrb.mxu0 %v229_v14  ;;  %181 = vmatpush.msra.mxu2 %v152_v1  ;;  %v275_v14 = vld [vmem:[#allocation5 + $0x2c0] sm:$0xff]  ;;  %v525_v1 = vld [vmem:[#allocation5 + $0x648] sm:$0xff] }
  0x4f   :  { %374 = vmatpush.msrb.mxu3 %v341_v12  ;;  %261 = vmatmul.f32.vlgmr.msrb.gmra.mxu0 %v986_v15  ;;  %v277_v12 = vld [vmem:[#allocation5 + $0x2d0] sm:$0xff] }
  0x50   :  { %375 = vmatmul.f32.vlgmr.msrb.gmra.mxu3 %v67_v13  ;;  %399 = vmatpush.msra.mxu0 %v396_v19  ;;  %v276_v13 = vld [vmem:[#allocation5 + $0x2c8] sm:$0xff]  ;;  %v287_v19 = vld [vmem:[#allocation5 + $0x318] sm:$0xff] }
  0x51   :  { %309 = vmatpush.msrb.mxu1 %v290_v61  ;;  %182 = vmatpush.msra.mxu2 %v151_v2  ;;  %v527_v61 = vld [vmem:[#allocation5 + $0x658] sm:$0xff]  ;;  %v508_v2 = vld [vmem:[#allocation5 + $0x5c8] sm:$0xff] }
  0x52   :  { %400 = vmatpush.msra.mxu0 %v395_v20  ;;  %v272_v20 = vld [vmem:[#allocation5 + $0x2a8] sm:$0xff]  ;;  %532 = vmatpush.msra.mxu3 %v531_v52 }
  0x53   :  { %310 = vmatpush.msrb.mxu1 %v289_v63  ;;  %183 = vmatpush.msra.mxu2 %v150_v5  ;;  %v526_v63 = vld [vmem:[#allocation5 + $0x650] sm:$0xff] }
  0x54   :  { %401 = vmatpush.msra.mxu0 %v394_v21  ;;  %v286_v21 = vld [vmem:[#allocation5 + $0x310] sm:$0xff]  ;;  %533 = vmatpush.msra.mxu3 %v530_v53  ;;  %v585_v53 = vld [vmem:[#allocation5 + $0x6e0] sm:$0xff] }
  0x55   :  { %320 = vmatpush.msrb.mxu2 %v282_v6  ;;  %311 = vmatpush.msrb.mxu1 %v288_v17  ;;  %v522_v5 = vld [vmem:[#allocation5 + $0x630] sm:$0xff]  ;;  %v805_v6 = vld [vmem:[#allocation7 + $0x5] ss:$0 sm:$0xff] }
  0x56   :  { %402 = vmatpush.msra.mxu0 %v393_v22  ;;  %v271_v22 = vld [vmem:[#allocation5 + $0x2a0] sm:$0xff]  ;;  %534 = vmatpush.msra.mxu3 %v529_v55  ;;  %v474_v17 = vld [vmem:[#allocation5 + $0x570] sm:$0xff] }
  0x57   :  { %321 = vmatpush.msrb.mxu2 %v281_v8  ;;  %312 = vmatpush.msrb.mxu1 %v287_v19  ;;  %v504_v19 = vld [vmem:[#allocation5 + $0x5a8] sm:$0xff]  ;;  %v583_v55 = vld [vmem:[#allocation5 + $0x6d0] sm:$0xff] }
  0x58   :  { %403 = vmatpush.msra.mxu0 %v392_v23  ;;  %v285_v23 = vld [vmem:[#allocation5 + $0x308] sm:$0xff] }
  0x59   :  { %322 = vmatpush.msrb.mxu2 %v280_v9  ;;  %313 = vmatpush.msrb.mxu1 %v286_v21  ;;  %v521_v9 = vld [vmem:[#allocation5 + $0x628] sm:$0xff] }
  0x5a   :  { %404 = vmatpush.msra.mxu0 %v391_v24  ;;  %v270_v24 = vld [vmem:[#allocation5 + $0x298] sm:$0xff]  ;;  %v517_v21 = vld [vmem:[#allocation5 + $0x608] sm:$0xff] }
  0x5b   :  { %323 = vmatpush.msrb.mxu2 %v279_v10  ;;  %314 = vmatpush.msrb.mxu1 %v285_v23  ;;  %v507_v10 = vld [vmem:[#allocation5 + $0x5c0] sm:$0xff] }
  0x5c   :  { %405 = vmatpush.msra.mxu0 %v390_v25  ;;  %v284_v25 = vld [vmem:[#allocation5 + $0x300] sm:$0xff] }
  0x5d   :  { %324 = vmatpush.msrb.mxu2 %v278_v11  ;;  %315 = vmatpush.msrb.mxu1 %v284_v25  ;;  %v520_v11 = vld [vmem:[#allocation5 + $0x620] sm:$0xff]  ;;  %v502_v25 = vld [vmem:[#allocation5 + $0x598] sm:$0xff] }
  0x5e   :  { %406 = vmatpush.msra.mxu0 %v389_v26  ;;  %v269_v26 = vld [vmem:[#allocation5 + $0x290] sm:$0xff]  ;;  %v472_v23 = vld [vmem:[#allocation5 + $0x560] sm:$0xff] }
  0x5f   :  { %325 = vmatpush.msrb.mxu2 %v277_v12  ;;  %v506_v12 = vld [vmem:[#allocation5 + $0x5b8] sm:$0xff] }
  0x60   :  { %407 = vmatpush.msra.mxu0 %v388_v27  ;;  %v435_v27 = vld [vmem:[#allocation5 + $0x4f8] sm:$0xff] }
  0x61   :  { %326 = vmatpush.msrb.mxu2 %v276_v13  ;;  %v475_v13 = vld [vmem:[#allocation5 + $0x578] sm:$0xff] }
  0x62   :  { %408 = vmatpush.msra.mxu0 %v387_v28  ;;  %v268_v28 = vld [vmem:[#allocation5 + $0x288] sm:$0xff] }
  0x63   :  { %327 = vmatpush.msrb.mxu2 %v275_v14  ;;  %v519_v14 = vld [vmem:[#allocation5 + $0x618] sm:$0xff] }
  0x64   :  { %409 = vmatpush.msra.mxu0 %v386_v29  ;;  %v434_v29 = vld [vmem:[#allocation5 + $0x4f0] sm:$0xff] }
  0x65   :  { %328 = vmatpush.msrb.mxu2 %v274_v16  ;;  %v505_v16 = vld [vmem:[#allocation5 + $0x5b0] sm:$0xff] }
  0x66   :  { %410 = vmatpush.msra.mxu0 %v385_v32  ;;  %v432_v32 = vld [vmem:[#allocation5 + $0x4e0] sm:$0xff] }
  0x67   :  { %329 = vmatpush.msrb.mxu2 %v273_v18  ;;  %v518_v18 = vld [vmem:[#allocation5 + $0x610] sm:$0xff] }
  0x68   :  { %411 = vmatpush.msra.mxu0 %v384_v34  ;;  %v430_v34 = vld [vmem:[#allocation5 + $0x4d0] sm:$0xff] }
  0x69   :  { %330 = vmatpush.msrb.mxu2 %v272_v20  ;;  %v473_v20 = vld [vmem:[#allocation5 + $0x568] sm:$0xff] }
  0x6a   :  { %412 = vmatpush.msra.mxu0 %v383_v36  ;;  %v428_v36 = vld [vmem:[#allocation5 + $0x4c0] sm:$0xff] }
  0x6b   :  { %331 = vmatpush.msrb.mxu2 %v271_v22  ;;  %v503_v22 = vld [vmem:[#allocation5 + $0x5a0] sm:$0xff] }
  0x6c   :  { %413 = vmatpush.msra.mxu0 %v382_v37  ;;  %v427_v37 = vld [vmem:[#allocation5 + $0x4b8] sm:$0xff] }
  0x6d   :  { %332 = vmatpush.msrb.mxu2 %v270_v24  ;;  %v516_v24 = vld [vmem:[#allocation5 + $0x600] sm:$0xff] }
  0x6e   :  { %414 = vmatpush.msra.mxu0 %v381_v38  ;;  %v426_v38 = vld [vmem:[#allocation5 + $0x4b0] sm:$0xff] }
  0x6f   :  { %333 = vmatpush.msrb.mxu2 %v269_v26  ;;  %v471_v26 = vld [vmem:[#allocation5 + $0x558] sm:$0xff] }
  0x70   :  { %552 = vmatpush.msrb.mxu0 %v514_v54  ;;  %v584_v54 = vld [vmem:[#allocation5 + $0x6d8] sm:$0xff] }
  0x71   :  { %334 = vmatpush.msrb.mxu2 %v268_v28  ;;  %v470_v28 = vld [vmem:[#allocation5 + $0x550] sm:$0xff] }
  0x72   :  { %553 = vmatpush.msrb.mxu0 %v513_v56  ;;  %v582_v56 = vld [vmem:[#allocation5 + $0x6c8] sm:$0xff] }
  0x74   :  { %554 = vmatpush.msrb.mxu0 %v512_v59  ;;  %v580_v59 = vld [vmem:[#allocation5 + $0x6b8] sm:$0xff] }
  0x76   :  { %555 = vmatpush.msrb.mxu0 %v511_v60  ;;  %v578_v60 = vld [vmem:[#allocation5 + $0x6a8] sm:$0xff] }
  0x78   :  { %556 = vmatpush.msrb.mxu0 %v510_v62  ;;  %v576_v62 = vld [vmem:[#allocation5 + $0x698] sm:$0xff] }
  0xac   :  { %v105_v31 = vpop.f32.mrf.mxu0 }
  0xad   :  { %v106_v33 = vadd.f32 %v801_v30, %v105_v31  ;;  %v267_v30 = vld [vmem:[#allocation5 + $0x280] sm:$0xff]  ;;  %v433_v31 = vld [vmem:[#allocation5 + $0x4e8] sm:$0xff] }
  0xae   :  { %335 = vmatpush.msrb.mxu2 %v267_v30  ;;  %v469_v30 = vld [vmem:[#allocation5 + $0x548] sm:$0xff] }
  0xaf   :  { %v108_v35 = vmax.f32 %v106_v33, 0.0  ;;  %v431_v33 = vld [vmem:[#allocation5 + $0x4d8] sm:$0xff] }
  0xb1   :  { %144 = vmatmul.f32.vlgmr.msra.gmra.mxu1 %v108_v35  ;;  %v429_v35 = vld [vmem:[#allocation5 + $0x4c8] sm:$0xff] }
  0xb2   :  { %438 = vmatpush.msra.mxu1 %v435_v27  ;;  %v501_v27 = vld [vmem:[#allocation5 + $0x590] sm:$0xff] }
  0xb3   :  { %v989_v57 = vpop.f32.mrf.mxu3 }
  0xb4   :  { %439 = vmatpush.msra.mxu1 %v434_v29  ;;  %v225_v46 = vadd.f32 %v802_v42, %v989_v57  ;;  %v528_v57 = vld [vmem:[#allocation5 + $0x660] sm:$0xff]  ;;  %v500_v29 = vld [vmem:[#allocation5 + $0x588] sm:$0xff] }
  0xb5   :  { %535 = vmatpush.msra.mxu3 %v528_v57  ;;  %v579_v57 = vld [vmem:[#allocation5 + $0x6b0] sm:$0xff] }
  0xb6   :  { %440 = vmatpush.msra.mxu1 %v433_v31  ;;  %v227_v50 = vmax.f32 %v225_v46, 0.0  ;;  %v499_v31 = vld [vmem:[#allocation5 + $0x580] sm:$0xff] }
  0xb7   :  { %536 = vmatpush.msra.mxu3 %v527_v61  ;;  %v577_v61 = vld [vmem:[#allocation5 + $0x6a0] sm:$0xff] }
  0xb8   :  { %441 = vmatpush.msra.mxu1 %v432_v32  ;;  %v468_v32 = vld [vmem:[#allocation5 + $0x540] sm:$0xff] }
  0xb9   :  { %316 = vmatmul.f32.vlgmr.msrb.gmra.mxu1 %v986_v15  ;;  %v424_v15 = vld [vmem:[#allocation5 + $0x4a0] sm:$0xff]  ;;  %537 = vmatpush.msra.mxu3 %v526_v63  ;;  %v575_v63 = vld [vmem:[#allocation5 + $0x690] sm:$0xff] }
  0xba   :  { %442 = vmatpush.msra.mxu1 %v431_v33  ;;  %v467_v33 = vld [vmem:[#allocation5 + $0x538] sm:$0xff] }
  0xbb   :  { %538 = vmatpush.msra.mxu3 %v525_v1  ;;  %v573_v1 = vld [vmem:[#allocation5 + $0x680] sm:$0xff] }
  0xbc   :  { %443 = vmatpush.msra.mxu1 %v430_v34  ;;  %v466_v34 = vld [vmem:[#allocation5 + $0x530] sm:$0xff] }
  0xbe   :  { %444 = vmatpush.msra.mxu1 %v429_v35  ;;  %v465_v35 = vld [vmem:[#allocation5 + $0x528] sm:$0xff] }
  0xc0   :  { %445 = vmatpush.msra.mxu1 %v428_v36  ;;  %v464_v36 = vld [vmem:[#allocation5 + $0x520] sm:$0xff] }
  0xc2   :  { %446 = vmatpush.msra.mxu1 %v427_v37  ;;  %v463_v37 = vld [vmem:[#allocation5 + $0x518] sm:$0xff] }
  0xc4   :  { %447 = vmatpush.msra.mxu1 %v426_v38  ;;  %v462_v38 = vld [vmem:[#allocation5 + $0x510] sm:$0xff] }
  0xc6   :  { %448 = vmatpush.msra.mxu1 %v425_v39  ;;  %v806_v39 = vld [vmem:[#allocation7 + $0x2] ss:$0 sm:$0xff] }
  0xc8   :  { %449 = vmatpush.msra.mxu1 %v424_v15  ;;  %v461_v15 = vld [vmem:[#allocation5 + $0x508] sm:$0xff] }
  0xca   :  { %450 = vmatpush.msra.mxu1 %v423_v41  ;;  %v460_v41 = vld [vmem:[#allocation5 + $0x500] sm:$0xff] }
  0xcc   :  { %451 = vmatpush.msra.mxu1 %v422_v44  ;;  %v262_v51 = vpop.f32.mrf.mxu0  ;;  %v587_v44 = vld [vmem:[#allocation5 + $0x6f0] sm:$0xff] }
  0xcd   :  { %v265_v58 = vmul.f32 %v262_v51, %v227_v50 }
  0xce   :  { %452 = vmatpush.msra.mxu1 %v421_v48 }
  0xd0   :  { %453 = vmatpush.msra.mxu1 %v420_v49  ;;  %v807_v49 = vld [vmem:[#allocation7 + $0x6] ss:$0 sm:$0xff] }
  0xd3   :  { %v376_v3 = vpop.f32.mrf.mxu3 }
  0xd4   :  { %v377_v4 = vadd.f32 %v803_v0, %v376_v3  ;;  %v509_v0 = vld [vmem:[#allocation5 + $0x5d0] sm:$0xff]  ;;  %v524_v3 = vld [vmem:[#allocation5 + $0x640] sm:$0xff] }
  0xd5   :  { %557 = vmatpush.msrb.mxu0 %v509_v0  ;;  %539 = vmatpush.msra.mxu3 %v524_v3  ;;  %v574_v0 = vld [vmem:[#allocation5 + $0x688] sm:$0xff]  ;;  %v629_v3 = vld [vmem:[#allocation5 + $0x770] sm:$0xff] }
  0xd6   :  { %v379_v7 = vmax.f32 %v377_v4, 0.0  ;;  %v523_v4 = vld [vmem:[#allocation5 + $0x638] sm:$0xff] }
  0xd7   :  { %558 = vmatpush.msrb.mxu0 %v508_v2  ;;  %540 = vmatpush.msra.mxu3 %v523_v4  ;;  %v630_v2 = vld [vmem:[#allocation5 + $0x778] sm:$0xff]  ;;  %v628_v4 = vld [vmem:[#allocation5 + $0x768] sm:$0xff] }
  0xd8   :  { %415 = vmatmul.f32.vlgmr.msra.gmra.mxu0 %v379_v7 }
  0xd9   :  { %541 = vmatpush.msra.mxu3 %v522_v5  ;;  %559 = vmatpush.msrb.mxu0 %v507_v10  ;;  %v627_v5 = vld [vmem:[#allocation5 + $0x760] sm:$0xff]  ;;  %v622_v10 = vld [vmem:[#allocation5 + $0x738] sm:$0xff] }
  0xdb   :  { %542 = vmatpush.msra.mxu3 %v521_v9  ;;  %560 = vmatpush.msrb.mxu0 %v506_v12  ;;  %v623_v9 = vld [vmem:[#allocation5 + $0x740] sm:$0xff]  ;;  %v620_v12 = vld [vmem:[#allocation5 + $0x728] sm:$0xff] }
  0xdd   :  { %543 = vmatpush.msra.mxu3 %v520_v11  ;;  %561 = vmatpush.msrb.mxu0 %v505_v16  ;;  %v621_v11 = vld [vmem:[#allocation5 + $0x730] sm:$0xff] }
  0xdf   :  { %544 = vmatpush.msra.mxu3 %v519_v14  ;;  %562 = vmatpush.msrb.mxu0 %v504_v19  ;;  %v808_v14 = vld [vmem:[#allocation7 + $0x7] ss:$0 sm:$0xff]  ;;  %v617_v19 = vld [vmem:[#allocation5 + $0x710] sm:$0xff] }
  0xe1   :  { %545 = vmatpush.msra.mxu3 %v518_v18  ;;  %563 = vmatpush.msrb.mxu0 %v503_v22  ;;  %v618_v18 = vld [vmem:[#allocation5 + $0x718] sm:$0xff] }
  0xe3   :  { %546 = vmatpush.msra.mxu3 %v517_v21  ;;  %564 = vmatpush.msrb.mxu0 %v502_v25  ;;  %v615_v21 = vld [vmem:[#allocation5 + $0x700] sm:$0xff]  ;;  %v809_v25 = vld [vmem:[#allocation7 + $0x8] ss:$0 sm:$0xff] }
  0xe5   :  { %547 = vmatpush.msra.mxu3 %v516_v24  ;;  %565 = vmatpush.msrb.mxu0 %v501_v27 }
  0xe7   :  { %566 = vmatpush.msrb.mxu0 %v500_v29 }
  0xe9   :  { %567 = vmatpush.msrb.mxu0 %v499_v31 }
 0x12e   :  { %v145_v43 = vpop.f32.mrf.mxu1 }
 0x12f   :  { %v146_v45 = vadd.f32 %v804_v40, %v145_v43  ;;  %v588_v43 = vld [vmem:[#allocation5 + $0x6f8] sm:$0xff] }
 0x130   :  { %589 = vmatpush.msrb.mxu1 %v588_v43 }
 0x131   :  { %v148_v47 = vmax.f32 %v146_v45, 0.0  ;;  %v586_v45 = vld [vmem:[#allocation5 + $0x6e8] sm:$0xff] }
 0x132   :  { %590 = vmatpush.msrb.mxu1 %v587_v44 }
 0x133   :  { %184 = vmatmul.f32.vlgmr.msra.gmra.mxu2 %v148_v47 }
 0x134   :  { %478 = vmatpush.msra.mxu2 %v475_v13  ;;  %591 = vmatpush.msrb.mxu1 %v586_v45  ;;  %v619_v13 = vld [vmem:[#allocation5 + $0x720] sm:$0xff]  ;;  %v690_v45 = vld [vmem:[#allocation5 + $0x7c8] sm:$0xff] }
 0x136   :  { %479 = vmatpush.msra.mxu2 %v474_v17  ;;  %v317_v46 = vpop.f32.mrf.mxu1  ;;  %592 = vmatpush.msrb.mxu1 %v585_v53  ;;  %v682_v53 = vld [vmem:[#allocation5 + $0x788] sm:$0xff] }
 0x138   :  { %480 = vmatpush.msra.mxu2 %v473_v20  ;;  %593 = vmatpush.msrb.mxu1 %v584_v54  ;;  %v616_v20 = vld [vmem:[#allocation5 + $0x708] sm:$0xff]  ;;  %v681_v54 = vld [vmem:[#allocation5 + $0x780] sm:$0xff] }
 0x13a   :  { %481 = vmatpush.msra.mxu2 %v472_v23  ;;  %594 = vmatpush.msrb.mxu1 %v583_v55  ;;  %v736_v55 = vld [vmem:[#allocation5 + $0x878] sm:$0xff] }
 0x13b   :  { %336 = vmatmul.f32.vlgmr.msrb.gmra.mxu2 %v265_v58  ;;  %v581_v58 = vld [vmem:[#allocation5 + $0x6c0] sm:$0xff]  ;;  %739 = vmatpush.msra.mxu0 %v736_v55 }
 0x13c   :  { %482 = vmatpush.msra.mxu2 %v471_v26  ;;  %595 = vmatpush.msrb.mxu1 %v582_v56  ;;  %v735_v56 = vld [vmem:[#allocation5 + $0x870] sm:$0xff] }
 0x13d   :  { %740 = vmatpush.msra.mxu0 %v735_v56 }
 0x13e   :  { %483 = vmatpush.msra.mxu2 %v470_v28  ;;  %596 = vmatpush.msrb.mxu1 %v581_v58  ;;  %v734_v58 = vld [vmem:[#allocation5 + $0x868] sm:$0xff] }
 0x13f   :  { %741 = vmatpush.msra.mxu0 %v734_v58 }
 0x140   :  { %484 = vmatpush.msra.mxu2 %v469_v30  ;;  %597 = vmatpush.msrb.mxu1 %v580_v59  ;;  %v653_v30 = vlaneseq  ;;  %v733_v59 = vld [vmem:[#allocation5 + $0x860] sm:$0xff] }
 0x141   :  { %742 = vmatpush.msra.mxu0 %v733_v59 }
 0x142   :  { %485 = vmatpush.msra.mxu2 %v468_v32  ;;  %598 = vmatpush.msrb.mxu1 %v579_v57  ;;  %v654_v31 = vand.u32 127, %v653_v30  ;;  %v810_v32 = vld [vmem:[#allocation7 + $0x9] ss:$0 sm:$0xff]  ;;  %v732_v57 = vld [vmem:[#allocation5 + $0x858] sm:$0xff] }
 0x143   :  { %743 = vmatpush.msra.mxu0 %v732_v57 }
 0x144   :  { %486 = vmatpush.msra.mxu2 %v467_v33  ;;  %599 = vmatpush.msrb.mxu1 %v578_v60  ;;  %vm655_vm0 = vcmp.lt.s32.totalorder %v654_v31, 4  ;;  %v731_v60 = vld [vmem:[#allocation5 + $0x850] sm:$0xff] }
 0x145   :  { %744 = vmatpush.msra.mxu0 %v731_v60 }
 0x146   :  { %487 = vmatpush.msra.mxu2 %v466_v34  ;;  %600 = vmatpush.msrb.mxu1 %v577_v61  ;;  %v730_v61 = vld [vmem:[#allocation5 + $0x848] sm:$0xff] }
 0x147   :  { %745 = vmatpush.msra.mxu0 %v730_v61 }
 0x148   :  { %488 = vmatpush.msra.mxu2 %v465_v35  ;;  %601 = vmatpush.msrb.mxu1 %v576_v62 }
 0x14a   :  { %489 = vmatpush.msra.mxu2 %v464_v36  ;;  %602 = vmatpush.msrb.mxu1 %v575_v63  ;;  %v696_v36 = vld [vmem:[#allocation5 + $0x7f8] sm:$0xff]  ;;  %v729_v63 = vld [vmem:[#allocation5 + $0x840] sm:$0xff] }
 0x14b   :  { %699 = vmatpush.msrb.mxu3 %v696_v36  ;;  %746 = vmatpush.msra.mxu0 %v729_v63 }
 0x14c   :  { %490 = vmatpush.msra.mxu2 %v463_v37  ;;  %603 = vmatpush.msrb.mxu1 %v574_v0  ;;  %v695_v37 = vld [vmem:[#allocation5 + $0x7f0] sm:$0xff]  ;;  %v728_v0 = vld [vmem:[#allocation5 + $0x838] sm:$0xff] }
 0x14d   :  { %700 = vmatpush.msrb.mxu3 %v695_v37  ;;  %747 = vmatpush.msra.mxu0 %v728_v0 }
 0x14e   :  { %491 = vmatpush.msra.mxu2 %v462_v38  ;;  %604 = vmatpush.msrb.mxu1 %v573_v1  ;;  %v694_v38 = vld [vmem:[#allocation5 + $0x7e8] sm:$0xff]  ;;  %v727_v1 = vld [vmem:[#allocation5 + $0x830] sm:$0xff] }
 0x14f   :  { %701 = vmatpush.msrb.mxu3 %v694_v38  ;;  %748 = vmatpush.msra.mxu0 %v727_v1 }
 0x150   :  { %492 = vmatpush.msra.mxu2 %v461_v15  ;;  %v692_v15 = vld [vmem:[#allocation5 + $0x7d8] sm:$0xff] }
 0x152   :  { %493 = vmatpush.msra.mxu2 %v460_v41 }
 0x154   :  { %633 = vmatpush.msrb.mxu2 %v630_v2  ;;  %v726_v2 = vld [vmem:[#allocation5 + $0x828] sm:$0xff] }
 0x155   :  { %v416_v7 = vpop.f32.mrf.mxu0  ;;  %749 = vmatpush.msra.mxu0 %v726_v2 }
 0x156   :  { %v417_v8 = vadd.f32 %v805_v6, %v416_v7  ;;  %634 = vmatpush.msrb.mxu2 %v629_v3  ;;  %v626_v6 = vld [vmem:[#allocation5 + $0x758] sm:$0xff]  ;;  %v625_v7 = vld [vmem:[#allocation5 + $0x750] sm:$0xff] }
 0x158   :  { %454 = vmatmul.f32.vlgmr.msra.gmra.mxu1 %v417_v8  ;;  %635 = vmatpush.msrb.mxu2 %v628_v4  ;;  %v624_v8 = vld [vmem:[#allocation5 + $0x748] sm:$0xff] }
 0x15a   :  { %636 = vmatpush.msrb.mxu2 %v627_v5  ;;  %v725_v5 = vld [vmem:[#allocation5 + $0x820] sm:$0xff] }
 0x15b   :  { %750 = vmatpush.msra.mxu0 %v725_v5 }
 0x15c   :  { %637 = vmatpush.msrb.mxu2 %v626_v6 }
 0x15e   :  { %638 = vmatpush.msrb.mxu2 %v625_v7  ;;  %v724_v7 = vld [vmem:[#allocation5 + $0x818] sm:$0xff] }
 0x15f   :  { %751 = vmatpush.msra.mxu0 %v724_v7 }
 0x160   :  { %639 = vmatpush.msrb.mxu2 %v624_v8 }
 0x162   :  { %640 = vmatpush.msrb.mxu2 %v623_v9 }
 0x164   :  { %641 = vmatpush.msrb.mxu2 %v622_v10 }
 0x166   :  { %642 = vmatpush.msrb.mxu2 %v621_v11 }
 0x168   :  { %643 = vmatpush.msrb.mxu2 %v620_v12 }
 0x16a   :  { %644 = vmatpush.msrb.mxu2 %v619_v13 }
 0x16c   :  { %645 = vmatpush.msrb.mxu2 %v618_v18  ;;  %v722_v18 = vld [vmem:[#allocation5 + $0x808] sm:$0xff] }
 0x16e   :  { %646 = vmatpush.msrb.mxu2 %v617_v19  ;;  %v721_v19 = vld [vmem:[#allocation5 + $0x800] sm:$0xff] }
 0x170   :  { %647 = vmatpush.msrb.mxu2 %v616_v20  ;;  %v811_v20 = vld [vmem:[#allocation7 + $0xa] ss:$0 sm:$0xff] }
 0x172   :  { %648 = vmatpush.msrb.mxu2 %v615_v21 }
 0x1b6   :  { %v185_v40 = vpop.f32.mrf.mxu2 }
 0x1b7   :  { %v186_v42 = vadd.f32 %v806_v39, %v185_v40  ;;  %v693_v39 = vld [vmem:[#allocation5 + $0x7e0] sm:$0xff]  ;;  %v691_v40 = vld [vmem:[#allocation5 + $0x7d0] sm:$0xff] }
 0x1b8   :  { %702 = vmatpush.msrb.mxu3 %v693_v39 }
 0x1b9   :  { %568 = vmatmul.f32.vlgmr.msrb.gmra.mxu0 %v186_v42 }
 0x1ba   :  { %703 = vmatpush.msrb.mxu3 %v692_v15 }
 0x1bc   :  { %704 = vmatpush.msrb.mxu3 %v691_v40 }
 0x1be   :  { %v337_v47 = vpop.f32.mrf.mxu2  ;;  %705 = vmatpush.msrb.mxu3 %v690_v45 }
 0x1bf   :  { %v338_v48 = vadd.f32 %v337_v47, %v317_v46  ;;  %v689_v46 = vld [vmem:[#allocation5 + $0x7c0] sm:$0xff]  ;;  %v688_v47 = vld [vmem:[#allocation5 + $0x7b8] sm:$0xff] }
 0x1c0   :  { %706 = vmatpush.msrb.mxu3 %v689_v46 }
 0x1c1   :  { %548 = vmatmul.f32.vlgmr.msra.gmra.mxu3 %v338_v48  ;;  %v687_v48 = vld [vmem:[#allocation5 + $0x7b0] sm:$0xff] }
 0x1c2   :  { %707 = vmatpush.msrb.mxu3 %v688_v47 }
 0x1c4   :  { %708 = vmatpush.msrb.mxu3 %v687_v48 }
 0x1d5   :  { %v455_v50 = vpop.f32.mrf.mxu1 }
 0x1d6   :  { %v456_v51 = vadd.f32 %v807_v49, %v455_v50  ;;  %v686_v49 = vld [vmem:[#allocation5 + $0x7a8] sm:$0xff]  ;;  %v685_v50 = vld [vmem:[#allocation5 + $0x7a0] sm:$0xff] }
 0x1d7   :  { %709 = vmatpush.msrb.mxu3 %v686_v49 }
 0x1d8   :  { %v458_v52 = vmax.f32 %v456_v51, 0.0  ;;  %v684_v51 = vld [vmem:[#allocation5 + $0x798] sm:$0xff] }
 0x1d9   :  { %710 = vmatpush.msrb.mxu3 %v685_v50 }
 0x1da   :  { %494 = vmatmul.f32.vlgmr.msra.gmra.mxu2 %v458_v52  ;;  %v683_v52 = vld [vmem:[#allocation5 + $0x790] sm:$0xff] }
 0x1db   :  { %711 = vmatpush.msrb.mxu3 %v684_v51 }
 0x1dd   :  { %712 = vmatpush.msrb.mxu3 %v683_v52 }
 0x1df   :  { %713 = vmatpush.msrb.mxu3 %v682_v53 }
 0x1e1   :  { %714 = vmatpush.msrb.mxu3 %v681_v54 }
 0x236   :  { %v569_v23 = vpop.f32.mrf.mxu0 }
 0x244   :  { %v549_v22 = vpop.f32.mrf.mxu3 }
 0x245   :  { %v570_v24 = vadd.f32 %v569_v23, %v549_v22 }
 0x25d   :  { %v495_v16 = vpop.f32.mrf.mxu2 }
 0x25e   :  { %v496_v17 = vadd.f32 %v808_v14, %v495_v16 }
 0x260   :  { %605 = vmatmul.f32.vlgmr.msrb.gmra.mxu1 %v496_v17  ;;  %v723_v17 = vld [vmem:[#allocation5 + $0x810] sm:$0xff] }
 0x261   :  { %752 = vmatpush.msra.mxu0 %v723_v17 }
 0x263   :  { %753 = vmatpush.msra.mxu0 %v722_v18 }
 0x265   :  { %754 = vmatpush.msra.mxu0 %v721_v19 }
 0x2dd   :  { %v606_v26 = vpop.f32.mrf.mxu1 }
 0x2de   :  { %v609_v27 = vadd.f32 %v606_v26, %v570_v24  ;;  %v812_v24 = vld [vmem:[#allocation7 + $0xb] ss:$0 sm:$0xff] }
 0x2e0   :  { %v612_v28 = vadd.f32 %v809_v25, %v609_v27 }
 0x2e2   :  { %v613_v29 = vmax.f32 %v612_v28, 0.0 }
 0x2e4   :  { %649 = vmatmul.f32.vlgmr.msrb.gmra.mxu2 %v613_v29 }
 0x367   :  { %v650_v33 = vpop.f32.mrf.mxu2 }
 0x368   :  { %v651_v34 = vadd.f32 %v810_v32, %v650_v33 }
 0x36a   :  { %v656_v35 = vsel %vm655_vm0, %v651_v34, -1e+30 }
 0x36b   :  { %657 = vmax.xlane.f32.xlu0 %v656_v35 }
 0x3de   :  { %v658_v41 = vpop.xlane.xlu0 %657 }
 0x3df   :  { %v659_v42 = vsub.f32 %v656_v35, %v658_v41 }
 0x3e1   :  { %v660_v43 = vmul.f32 1.442695, %v659_v42 }
 0x3e3   :  { %813 = vpow2.f32 %v660_v43 }
 0x3e9   :  { %v993_v44 = vpop.eup %813 }
 0x3ea   :  { %662 = vadd.xlane.f32.xlu0 %v993_v44 }
 0x45d   :  { %v663_v62 = vpop.xlane.xlu0 %662 }
 0x45e   :  { %815 = vrcp.f32 %v663_v62  ;;  %v675_v8 = vand.u32 2147483648, %v663_v62  ;;  %v673_v10 = vand.u32 2147483647, %v663_v62  ;;  %vm669_vm2 = vweird.f32 %v663_v62 }
 0x460   :  { %v676_v12 = vor.u32 1.1754944e-38, %v675_v8  ;;  %vm674_vm4 = vcmp.eq.f32.partialorder %v673_v10, 8.507059e+37 }
 0x464   :  { %v816_v3 = vpop.eup %815 }
 0x465   :  { %v665_v4 = vmul.f32 %v816_v3, %v663_v62  ;;  %vm670_vm1 = vweird.f32 %v816_v3 }
 0x466   :  { %vm671_vm3 = vmor %vm669_vm2, %vm670_vm1 }
 0x467   :  { %v666_v6 = vsub.f32 1.0, %v665_v4 }
 0x469   :  { %v667_v9 = vmul.f32 %v816_v3, %v666_v6 }
 0x46b   :  { %v668_v11 = vadd.f32 %v816_v3, %v667_v9 }
 0x46d   :  { %v672_v13 = vsel %vm671_vm3, %v816_v3, %v668_v11 }
 0x46e   :  { %v677_v14 = vsel %vm674_vm4, %v676_v12, %v672_v13 }
 0x46f   :  { %v678_v16 = vmul.f32 %v993_v44, %v677_v14 }
 0x471   :  { %715 = vmatmul.f32.vlgmr.msrb.gmra.mxu3 %v678_v16  ;;  %679 = vst [vmem:[#allocation8] sm:$0xff] %v678_v16 }
 0x472   :  { %770 = dma.vmem_to_hbm [thread:$0]  %s766_s2, 128, %s768_s7, [#allocation4]  }
 0x4f4   :  { %v716_v21 = vpop.f32.mrf.mxu3 }
 0x4f5   :  { %v717_v22 = vadd.f32 %v811_v20, %v716_v21 }
 0x4f7   :  { %v719_v23 = vmax.f32 %v717_v22, 0.0 }
 0x4f9   :  { %755 = vmatmul.f32.vlgmr.msra.gmra.mxu0 %v719_v23 }
 0x576   :  { %v756_v25 = vpop.f32.mrf.mxu0 }
 0x577   :  { %v757_v26 = vadd.f32 %v812_v24, %v756_v25 }
 0x579   :  { %759 = vst [vmem:[#allocation9] sm:$0xff] %v757_v26 }
 0x57a   :  { %781 = dma.vmem_to_hbm [thread:$0]  %s777_s9, 128, %s779_s12, [#allocation10]  }
 0x57b   :  { %941 = dma.done.wait [#allocation4], 128  }
 0x57c   :  { %942 = vsyncadd [#allocation4], 4294967168 }
 0x57d   :  { %943 = dma.done.wait [#allocation10], 128  }
 0x57e   :  { %944 = vsyncadd [#allocation10], 4294967168 }
 0x57f   :  { %790 = vsyncpa [#allocation3], 1 }
 0x580   :  { %791 = vsyncpa [#allocation6], 1 }
 0x581   :  { %792 = vsyncpa [#allocation4], 1 }
 0x582   :  { %793 = vsyncpa [#allocation10], 1 }

</bundles_post_ra>
